<compile_context>
chip_gen: v7x
topology: tpu7x:2x2x1
jax: 0.10.0
libtpu: 0.0.40
codegen_flags: <defaults>
</compile_context>

<pallas_src>
import functools

import jax
import jax.numpy as jnp
from jax.experimental import pallas as pl
from jax.experimental.pallas import tpu as pltpu


def _round_up(n, m):
    return (n + m - 1) // m * m


# -----------------------------------------------------------------------------
# Fused ConvNeXt block kernel: one (batch, time-tile) grid step per invocation.
#   depthwise conv(k=7, pad=3) -> LayerNorm(C, eps=1e-6) -> Linear -> GELU ->
#   Linear -> layer-scale gamma -> residual add
# -----------------------------------------------------------------------------
def _convnext_kernel(xpad_hbm, dww_ref, dwb_ref, lng_ref, lnb_ref,
                     w1_ref, b1_ref, w2_ref, b2_ref, gamma_ref,
                     o_ref, slab_ref, sem,
                     *, tile_t, self_issue_dma, approx_gelu):
    b = pl.program_id(0)
    t = pl.program_id(1)
    num_t = pl.num_programs(1)
    slab_rows = slab_ref.shape[1]              # tile_t + 8 (6-row halo + alignment)

    def slab_copy(tt, slot):
        start = pl.multiple_of(tt * tile_t, 8)
        return pltpu.make_async_copy(
            xpad_hbm.at[b, pl.ds(start, slab_rows), :],
            slab_ref.at[slot],
            sem.at[slot])

    slot = t % 2

    if self_issue_dma:
        # Every step is independent => the time axis may be 'parallel' (v7x 2 TCs).
        slab_copy(t, slot).start()
    else:
        # Sequential time axis: tile 0 self-issues; later tiles were prefetched by
        # the previous step.  Always prefetch the next tile into the other buffer.
        @pl.when(t == 0)
        def _():
            slab_copy(t, 0).start()

        @pl.when(t + 1 < num_t)
        def _():
            slab_copy(t + 1, 1 - slot).start()

    slab_copy(t, slot).wait()

    xs = slab_ref[slot]                        # (slab_rows, C), native activation dtype

    # ---- depthwise conv, kernel_size=7, groups=C ----------------------------
    # Shifts are static sublane slices of the slab (native dtype); FMA in f32.
    dww = dww_ref[...].astype(jnp.float32)     # (8, C); row 7 is zero padding
    acc = dwb_ref[...].astype(jnp.float32)     # (1, C) bias, broadcasts over rows
    resid = None
    for k in range(7):
        rows = xs[k:k + tile_t, :]             # rows[r] == x_pad[tile_start + r + k]
        if k == 3:
            resid = rows.astype(jnp.float32)   # centre tap == the un-convolved input
        acc = acc + rows.astype(jnp.float32) * dww[k:k + 1, :]
    y = acc                                    # (tile_t, C) f32

    # ---- LayerNorm over channels (eps=1e-6), f32 math ------------------------
    # Row reductions via the MXU (dot with a ones column) instead of XLU lane
    # reductions; the MXU has slack here.
    c = y.shape[-1]
    ones_c = jnp.ones((c, 1), jnp.float32)
    inv_c = 1.0 / c
    mean = jnp.dot(y, ones_c, preferred_element_type=jnp.float32) * inv_c
    yc = y - mean
    var = jnp.dot(yc * yc, ones_c, preferred_element_type=jnp.float32) * inv_c
    y = yc * jax.lax.rsqrt(var + 1e-6)
    y = y * lng_ref[...].astype(jnp.float32) + lnb_ref[...].astype(jnp.float32)

    # ---- pointwise MLP on the MXU: low-precision operands, f32 accumulation ---
    cd = w1_ref.dtype
    h = jnp.dot(y.astype(cd), w1_ref[...], preferred_element_type=jnp.float32)
    h = h + b1_ref[...].astype(jnp.float32)
    h = jax.nn.gelu(h, approximate=approx_gelu)      # tanh GELU -> EUP slot
    z = jnp.dot(h.astype(cd), w2_ref[...], preferred_element_type=jnp.float32)
    z = z + b2_ref[...].astype(jnp.float32)

    # ---- layer scale + residual (Dropout / DropPath are Identity at inference) -
    z = z * gamma_ref[...].astype(jnp.float32)
    o_ref[0] = (resid + z).astype(o_ref.dtype)


# -----------------------------------------------------------------------------
# Wrappers
# -----------------------------------------------------------------------------
def convnext_block_ntc(x, p, *, tile_t=512, mxu_dtype=jnp.bfloat16,
                       approx_gelu=True, time_parallel=None,
                       vmem_limit_bytes=48 * 1024 * 1024):
    """ConvNeXtBlock forward, channels-last. x: (B, T, C) -> (B, T, C).

    Prefer this entry point when stacking blocks (keeps activations channels-last;
    only transpose at model entry / exit).  mxu_dtype=None + approx_gelu=False
    reproduces the f32 / erf-GELU torch numerics exactly.
    """
    B, T, C = x.shape
    dtype = x.dtype

    tile_t = max(8, min(int(tile_t), _round_up(T, 8)))
    tile_t = _round_up(tile_t, 8)
    num_t = pl.cdiv(T, tile_t)
    T_round = num_t * tile_t
    slab = tile_t + 8                          # 6-row conv halo + 2 alignment rows

    # Weight prep (cheap; fuses into the surrounding XLA program).
    inter = p["w1"].shape[1]
    inter_pad = _round_up(inter, 128)          # lane-pad intermediate dim (zeros -> 0)
    cd = dtype if mxu_dtype is None else mxu_dtype
    w1 = p["w1"].astype(cd)
    w2 = p["w2"].astype(cd)
    b1 = p["b1"].astype(jnp.float32)
    if inter_pad != inter:
        w1 = jnp.pad(w1, ((0, 0), (0, inter_pad - inter)))
        b1 = jnp.pad(b1, ((0, inter_pad - inter),))
        w2 = jnp.pad(w2, ((0, inter_pad - inter), (0, 0)))
    dww = jnp.pad(p["dw_w"], ((0, 1), (0, 0)))            # (7, C) -> (8, C)

    # Single halo / tile-rounding pad for the whole block; stays in HBM (pl.ANY)
    # and is consumed by manual per-tile slab DMAs inside the kernel.
    xpad = jnp.pad(x, ((0, 0), (3, (T_round - T) + 5), (0, 0)))   # (B, T_round+8, C)

    # B == 1 would idle one TensorCore on multi-core chips (v7x) with a sequential
    # time axis; self-issue the slab DMA per step so time can shard across cores.
    self_issue = (B == 1) if time_parallel is None else bool(time_parallel)

    kernel = functools.partial(_convnext_kernel, tile_t=tile_t,
                               self_issue_dma=self_issue, approx_gelu=approx_gelu)

    # Whole-array VMEM residents: no grid windowing => single buffer per weight.
    resident = pl.BlockSpec(memory_space=pltpu.MemorySpace.VMEM)

    out = pl.pallas_call(
        kernel,
        out_shape=jax.ShapeDtypeStruct((B, T, C), dtype),
        grid=(B, num_t),
        in_specs=[
            pl.BlockSpec(memory_space=pl.ANY),   # padded activations stay in HBM
            resident,                            # dw_w   (8, C)
            resident,                            # dw_b   (1, C)
            resident,                            # ln_g   (1, C)
            resident,                            # ln_b   (1, C)
            resident,                            # w1     (C, inter_pad)
            resident,                            # b1     (1, inter_pad)
            resident,                            # w2     (inter_pad, C)
            resident,                            # b2     (1, C)
            resident,                            # gamma  (1, C)
        ],
        # Lane-dense output; the partial last time block is masked by Pallas.
        out_specs=pl.BlockSpec((1, tile_t, C), lambda b, t: (b, t, 0)),
        scratch_shapes=[
            pltpu.VMEM((2, slab, C), dtype),     # double-buffered halo slab
            pltpu.SemaphoreType.DMA((2,)),
        ],
        compiler_params=pltpu.CompilerParams(
            dimension_semantics=("parallel",
                                 "parallel" if self_issue else "arbitrary"),
            # 48 MiB: headroom on v7x (64 MiB physical); raise on v5e/v6e if sweeping
            # bigger tile_t.
            vmem_limit_bytes=vmem_limit_bytes,
        ),
    )(xpad, dww,
      p["dw_b"].reshape(1, C).astype(jnp.float32),
      p["ln_g"].reshape(1, C).astype(jnp.float32),
      p["ln_b"].reshape(1, C).astype(jnp.float32),
      w1, b1.reshape(1, inter_pad), w2,
      p["b2"].reshape(1, C).astype(jnp.float32),
      p["gamma"].reshape(1, C).astype(jnp.float32))

    return out


def convnext_block_nct(x_nct, params, **kw):
    """Matches the PyTorch module signature: x is (B, dim, T), returns (B, dim, T)."""
    x = jnp.transpose(x_nct, (0, 2, 1))        # NCT -> NTC (channels on lanes)
    y = convnext_block_ntc(x, params, **kw)
    return jnp.transpose(y, (0, 2, 1))


# -----------------------------------------------------------------------------
# Deterministic synthetic parameters (kernel-friendly layouts; see header)
# -----------------------------------------------------------------------------
def init_params(key, dim, intermediate_dim, layer_scale_init_value=0.1):
    ks = jax.random.split(key, 6)

    def rnd(k, shape, scale=0.02):
        return (scale * jax.random.normal(k, shape)).astype(jnp.float32)

    return {
        "dw_w": rnd(ks[0], (7, dim)),                 # torch dwconv.weight (C,1,7) transposed
        "dw_b": rnd(ks[1], (dim,)),
        "ln_g": jnp.ones((dim,), jnp.float32),
        "ln_b": jnp.zeros((dim,), jnp.float32),
        "w1": rnd(ks[2], (dim, intermediate_dim)),    # torch pwconv1.weight.T
        "b1": rnd(ks[3], (intermediate_dim,)),
        "w2": rnd(ks[4], (intermediate_dim, dim)),    # torch pwconv2.weight.T
        "b2": rnd(ks[5], (dim,)),
        "gamma": jnp.full((dim,), layer_scale_init_value, jnp.float32),
    }


# -----------------------------------------------------------------------------
# Pure-JAX reference (same math / same precision policy, no Pallas)
# -----------------------------------------------------------------------------
def ref_convnext_block_ntc(x, p, *, mxu_dtype=jnp.bfloat16, approx_gelu=True):
    T = x.shape[1]
    xf = x.astype(jnp.float32)
    xp = jnp.pad(xf, ((0, 0), (3, 3), (0, 0)))
    y = sum(xp[:, k:k + T] * p["dw_w"][k] for k in range(7)) + p["dw_b"]
    mean = jnp.mean(y, -1, keepdims=True)
    var = jnp.mean(jnp.square(y - mean), -1, keepdims=True)
    y = (y - mean) * jax.lax.rsqrt(var + 1e-6) * p["ln_g"] + p["ln_b"]
    cd = x.dtype if mxu_dtype is None else mxu_dtype
    h = jnp.dot(y.astype(cd), p["w1"].astype(cd),
                preferred_element_type=jnp.float32) + p["b1"]
    h = jax.nn.gelu(h, approximate=approx_gelu)
    z = jnp.dot(h.astype(cd), p["w2"].astype(cd),
                preferred_element_type=jnp.float32) + p["b2"]
    y = xf + p["gamma"] * z
    return y.astype(x.dtype)


def ref_convnext_block_nct(x_nct, p, **kw):
    y = ref_convnext_block_ntc(jnp.transpose(x_nct, (0, 2, 1)), p, **kw)
    return jnp.transpose(y, (0, 2, 1))


if __name__ == "__main__":
    # Small shapes consistent with the module's forward: x is (B, dim, T).
    B, dim, T = 2, 128, 200
    intermediate_dim = 320        # deliberately NOT a multiple of 128 (padded inside)
    tile_t = 64                   # small tile: exercises multi-tile pipelining and
                                  # the masked partial last block (200 % 64 != 0)

    key = jax.random.PRNGKey(0)
    kx, kp = jax.random.split(key)
    x = jax.random.normal(kx, (B, dim, T), dtype=jnp.float32)
    params = init_params(kp, dim, intermediate_dim)

    fn = jax.jit(lambda a: convnext_block_nct(a, params, tile_t=tile_t))
    out = jax.block_until_ready(fn(x))
    ref = ref_convnext_block_nct(x, params)

    assert out.shape == (B, dim, T), out.shape
    assert bool(jnp.all(jnp.isfinite(out)))
    err = float(jnp.max(jnp.abs(out - ref)))
    assert err < 5e-3, f"max abs err vs reference: {err}"

    # Also exercise the B == 1 path (self-issued slab DMA, time axis 'parallel').
    x1 = x[:1, :, :96]
    fn1 = jax.jit(lambda a: convnext_block_nct(a, params, tile_t=tile_t))
    out1 = jax.block_until_ready(fn1(x1))
    ref1 = ref_convnext_block_nct(x1, params)
    err1 = float(jnp.max(jnp.abs(out1 - ref1)))
    assert err1 < 5e-3, f"max abs err vs reference (B=1 path): {err1}"

    print("KERNEL_OK")
</pallas_src>

<mosaic_0001>
module attributes {stable_mosaic.version = 11 : i64} {
  func.func @_convnext_kernel(%arg0: i32, %arg1: i32, %arg2: memref<2x264x128xf32, #tpu.memory_space<any>>, %arg3: memref<8x128xf32, #tpu.memory_space<vmem>>, %arg4: memref<1x128xf32, #tpu.memory_space<vmem>>, %arg5: memref<1x128xf32, #tpu.memory_space<vmem>>, %arg6: memref<1x128xf32, #tpu.memory_space<vmem>>, %arg7: memref<128x384xbf16, #tpu.memory_space<vmem>>, %arg8: memref<1x384xf32, #tpu.memory_space<vmem>>, %arg9: memref<384x128xbf16, #tpu.memory_space<vmem>>, %arg10: memref<1x128xf32, #tpu.memory_space<vmem>>, %arg11: memref<1x128xf32, #tpu.memory_space<vmem>>, %arg12: memref<1x64x128xf32, #tpu.memory_space<vmem>>, %arg13: memref<2x72x128xf32, #tpu.memory_space<vmem>>, %arg14: memref<2x!tpu.dma_semaphore, #tpu.memory_space<semaphore_mem>>) attributes {dimension_semantics = [#tpu.dimension_semantics<parallel>, #tpu.dimension_semantics<arbitrary>], iteration_bounds = array<i64: 2, 4>, scalar_prefetch = 0 : i64, scratch_operands = 2 : i64, tpu.core_type = #tpu.core_type<tc>, window_params = [{}, {pipeline_mode = #tpu.pipeline_mode<synchronous>, transform_indices = @transform_1, window_bounds = array<i64: 8, 128>}, {pipeline_mode = #tpu.pipeline_mode<synchronous>, transform_indices = @transform_2, window_bounds = array<i64: 1, 128>}, {pipeline_mode = #tpu.pipeline_mode<synchronous>, transform_indices = @transform_3, window_bounds = array<i64: 1, 128>}, {pipeline_mode = #tpu.pipeline_mode<synchronous>, transform_indices = @transform_4, window_bounds = array<i64: 1, 128>}, {pipeline_mode = #tpu.pipeline_mode<synchronous>, transform_indices = @transform_5, window_bounds = array<i64: 128, 384>}, {pipeline_mode = #tpu.pipeline_mode<synchronous>, transform_indices = @transform_6, window_bounds = array<i64: 1, 384>}, {pipeline_mode = #tpu.pipeline_mode<synchronous>, transform_indices = @transform_7, window_bounds = array<i64: 384, 128>}, {pipeline_mode = #tpu.pipeline_mode<synchronous>, transform_indices = @transform_8, window_bounds = array<i64: 1, 128>}, {pipeline_mode = #tpu.pipeline_mode<synchronous>, transform_indices = @transform_9, window_bounds = array<i64: 1, 128>}, {transform_indices = @transform_10, window_bounds = array<i64: 1, 64, 128>}]} {
    %c2_i32 = arith.constant 2 : i32
    %c0_i32 = arith.constant 0 : i32
    %0 = arith.cmpi eq, %c2_i32, %c0_i32 : i32
    %c1_i32 = arith.constant 1 : i32
    %1 = arith.select %0, %c1_i32, %c2_i32 : i32
    %2 = arith.remsi %arg1, %1 : i32
    %c0_i32_0 = arith.constant 0 : i32
    %3 = arith.cmpi ne, %2, %c0_i32_0 : i32
    %c0_i32_1 = arith.constant 0 : i32
    %4 = arith.cmpi slt, %2, %c0_i32_1 : i32
    %c0_i32_2 = arith.constant 0 : i32
    %5 = arith.cmpi slt, %1, %c0_i32_2 : i32
    %6 = arith.xori %4, %5 : i1
    %7 = arith.andi %6, %3 : i1
    %8 = arith.addi %2, %1 : i32
    %9 = arith.select %7, %8, %2 : i32
    %c0_i32_3 = arith.constant 0 : i32
    %10 = arith.cmpi eq, %arg1, %c0_i32_3 : i32
    %11 = arith.extui %10 : i1 to i32
    %c0_i32_4 = arith.constant 0 : i32
    %12 = arith.cmpi ne, %11, %c0_i32_4 : i32
    scf.if %12 {
      %c64_i32_43 = arith.constant 64 : i32
      %119 = arith.muli %arg1, %c64_i32_43 : i32
      %120 = tpu.assume_multiple %119, 8 : i32
      %c0_i32_44 = arith.constant 0 : i32
      %c0_i32_45 = arith.constant 0 : i32
      %c0_i32_46 = arith.constant 0 : i32
      %121 = tpu.memref_slice %arg2[%arg0, %120, %c0_i32_46] : memref<2x264x128xf32, #tpu.memory_space<any>> -> memref<1x72x128xf32, #tpu.memory_space<any>>
      %122 = tpu.memref_squeeze %121 : memref<1x72x128xf32, #tpu.memory_space<any>> -> memref<72x128xf32, #tpu.memory_space<any>>
      %c0_i32_47 = arith.constant 0 : i32
      %c0_i32_48 = arith.constant 0 : i32
      %123 = tpu.memref_slice %arg13[%c0_i32_44, %c0_i32_47, %c0_i32_48] : memref<2x72x128xf32, #tpu.memory_space<vmem>> -> memref<1x72x128xf32, #tpu.memory_space<vmem>>
      %124 = tpu.memref_squeeze %123 : memref<1x72x128xf32, #tpu.memory_space<vmem>> -> memref<72x128xf32, #tpu.memory_space<vmem>>
      %125 = tpu.memref_slice %arg14[%c0_i32_45] : memref<2x!tpu.dma_semaphore, #tpu.memory_space<semaphore_mem>> -> memref<1x!tpu.dma_semaphore, #tpu.memory_space<semaphore_mem>>
      %126 = tpu.memref_squeeze %125 : memref<1x!tpu.dma_semaphore, #tpu.memory_space<semaphore_mem>> -> memref<!tpu.dma_semaphore, #tpu.memory_space<semaphore_mem>>
      tpu.enqueue_dma source(%122 : memref<72x128xf32, #tpu.memory_space<any>>) target(%124 : memref<72x128xf32, #tpu.memory_space<vmem>>) target_semaphore(%126 : memref<!tpu.dma_semaphore, #tpu.memory_space<semaphore_mem>>)
    } else {
    }
    %c1_i32_5 = arith.constant 1 : i32
    %13 = arith.addi %arg1, %c1_i32_5 : i32
    %c4_i32 = arith.constant 4 : i32
    %14 = arith.cmpi slt, %13, %c4_i32 : i32
    %15 = arith.extui %14 : i1 to i32
    %c0_i32_6 = arith.constant 0 : i32
    %16 = arith.cmpi ne, %15, %c0_i32_6 : i32
    scf.if %16 {
      %c1_i32_43 = arith.constant 1 : i32
      %119 = arith.addi %arg1, %c1_i32_43 : i32
      %c1_i32_44 = arith.constant 1 : i32
      %120 = arith.subi %c1_i32_44, %9 : i32
      %c64_i32_45 = arith.constant 64 : i32
      %121 = arith.muli %119, %c64_i32_45 : i32
      %122 = tpu.assume_multiple %121, 8 : i32
      %c0_i32_46 = arith.constant 0 : i32
      %123 = tpu.memref_slice %arg2[%arg0, %122, %c0_i32_46] : memref<2x264x128xf32, #tpu.memory_space<any>> -> memref<1x72x128xf32, #tpu.memory_space<any>>
      %124 = tpu.memref_squeeze %123 : memref<1x72x128xf32, #tpu.memory_space<any>> -> memref<72x128xf32, #tpu.memory_space<any>>
      %c0_i32_47 = arith.constant 0 : i32
      %c0_i32_48 = arith.constant 0 : i32
      %125 = tpu.memref_slice %arg13[%120, %c0_i32_47, %c0_i32_48] : memref<2x72x128xf32, #tpu.memory_space<vmem>> -> memref<1x72x128xf32, #tpu.memory_space<vmem>>
      %126 = tpu.memref_squeeze %125 : memref<1x72x128xf32, #tpu.memory_space<vmem>> -> memref<72x128xf32, #tpu.memory_space<vmem>>
      %127 = tpu.memref_slice %arg14[%120] : memref<2x!tpu.dma_semaphore, #tpu.memory_space<semaphore_mem>> -> memref<1x!tpu.dma_semaphore, #tpu.memory_space<semaphore_mem>>
      %128 = tpu.memref_squeeze %127 : memref<1x!tpu.dma_semaphore, #tpu.memory_space<semaphore_mem>> -> memref<!tpu.dma_semaphore, #tpu.memory_space<semaphore_mem>>
      tpu.enqueue_dma source(%124 : memref<72x128xf32, #tpu.memory_space<any>>) target(%126 : memref<72x128xf32, #tpu.memory_space<vmem>>) target_semaphore(%128 : memref<!tpu.dma_semaphore, #tpu.memory_space<semaphore_mem>>)
    } else {
    }
    %c64_i32 = arith.constant 64 : i32
    %17 = arith.muli %arg1, %c64_i32 : i32
    %18 = tpu.assume_multiple %17, 8 : i32
    %c0_i32_7 = arith.constant 0 : i32
    %19 = tpu.memref_slice %arg2[%arg0, %18, %c0_i32_7] : memref<2x264x128xf32, #tpu.memory_space<any>> -> memref<1x72x128xf32, #tpu.memory_space<any>>
    %20 = tpu.memref_squeeze %19 : memref<1x72x128xf32, #tpu.memory_space<any>> -> memref<72x128xf32, #tpu.memory_space<any>>
    %c0_i32_8 = arith.constant 0 : i32
    %c0_i32_9 = arith.constant 0 : i32
    %21 = tpu.memref_slice %arg13[%9, %c0_i32_8, %c0_i32_9] : memref<2x72x128xf32, #tpu.memory_space<vmem>> -> memref<1x72x128xf32, #tpu.memory_space<vmem>>
    %22 = tpu.memref_squeeze %21 : memref<1x72x128xf32, #tpu.memory_space<vmem>> -> memref<72x128xf32, #tpu.memory_space<vmem>>
    %23 = tpu.memref_slice %arg14[%9] : memref<2x!tpu.dma_semaphore, #tpu.memory_space<semaphore_mem>> -> memref<1x!tpu.dma_semaphore, #tpu.memory_space<semaphore_mem>>
    %24 = tpu.memref_squeeze %23 : memref<1x!tpu.dma_semaphore, #tpu.memory_space<semaphore_mem>> -> memref<!tpu.dma_semaphore, #tpu.memory_space<semaphore_mem>>
    tpu.wait_dma2 semaphore(%24 : memref<!tpu.dma_semaphore, #tpu.memory_space<semaphore_mem>>) src(%20 : memref<72x128xf32, #tpu.memory_space<any>>) dst(%22 : memref<72x128xf32, #tpu.memory_space<vmem>>)
    %25 = arith.index_cast %9 : i32 to index
    %c0 = arith.constant 0 : index
    %c0_10 = arith.constant 0 : index
    %26 = vector.load %arg13[%25, %c0, %c0_10] : memref<2x72x128xf32, #tpu.memory_space<vmem>>, vector<1x72x128xf32>
    %27 = vector.shape_cast %26 : vector<1x72x128xf32> to vector<72x128xf32>
    %c0_11 = arith.constant 0 : index
    %c0_12 = arith.constant 0 : index
    %28 = vector.load %arg3[%c0_11, %c0_12] : memref<8x128xf32, #tpu.memory_space<vmem>>, vector<8x128xf32>
    %c0_13 = arith.constant 0 : index
    %c0_14 = arith.constant 0 : index
    %29 = vector.load %arg4[%c0_13, %c0_14] : memref<1x128xf32, #tpu.memory_space<vmem>>, vector<1x128xf32>
    %30 = vector.extract_strided_slice %27 {offsets = [0, 0], sizes = [64, 128], strides = [1, 1]} : vector<72x128xf32> to vector<64x128xf32>
    %31 = vector.extract_strided_slice %28 {offsets = [0, 0], sizes = [1, 128], strides = [1, 1]} : vector<8x128xf32> to vector<1x128xf32>
    %32 = vector.broadcast %31 : vector<1x128xf32> to vector<64x128xf32>
    %33 = arith.mulf %30, %32 : vector<64x128xf32>
    %34 = vector.broadcast %29 : vector<1x128xf32> to vector<64x128xf32>
    %35 = arith.addf %34, %33 : vector<64x128xf32>
    %36 = vector.extract_strided_slice %27 {offsets = [1, 0], sizes = [64, 128], strides = [1, 1]} : vector<72x128xf32> to vector<64x128xf32>
    %37 = vector.extract_strided_slice %28 {offsets = [1, 0], sizes = [1, 128], strides = [1, 1]} : vector<8x128xf32> to vector<1x128xf32>
    %38 = vector.broadcast %37 : vector<1x128xf32> to vector<64x128xf32>
    %39 = arith.mulf %36, %38 : vector<64x128xf32>
    %40 = arith.addf %35, %39 : vector<64x128xf32>
    %41 = vector.extract_strided_slice %27 {offsets = [2, 0], sizes = [64, 128], strides = [1, 1]} : vector<72x128xf32> to vector<64x128xf32>
    %42 = vector.extract_strided_slice %28 {offsets = [2, 0], sizes = [1, 128], strides = [1, 1]} : vector<8x128xf32> to vector<1x128xf32>
    %43 = vector.broadcast %42 : vector<1x128xf32> to vector<64x128xf32>
    %44 = arith.mulf %41, %43 : vector<64x128xf32>
    %45 = arith.addf %40, %44 : vector<64x128xf32>
    %46 = vector.extract_strided_slice %27 {offsets = [3, 0], sizes = [64, 128], strides = [1, 1]} : vector<72x128xf32> to vector<64x128xf32>
    %47 = vector.extract_strided_slice %28 {offsets = [3, 0], sizes = [1, 128], strides = [1, 1]} : vector<8x128xf32> to vector<1x128xf32>
    %48 = vector.broadcast %47 : vector<1x128xf32> to vector<64x128xf32>
    %49 = arith.mulf %46, %48 : vector<64x128xf32>
    %50 = arith.addf %45, %49 : vector<64x128xf32>
    %51 = vector.extract_strided_slice %27 {offsets = [4, 0], sizes = [64, 128], strides = [1, 1]} : vector<72x128xf32> to vector<64x128xf32>
    %52 = vector.extract_strided_slice %28 {offsets = [4, 0], sizes = [1, 128], strides = [1, 1]} : vector<8x128xf32> to vector<1x128xf32>
    %53 = vector.broadcast %52 : vector<1x128xf32> to vector<64x128xf32>
    %54 = arith.mulf %51, %53 : vector<64x128xf32>
    %55 = arith.addf %50, %54 : vector<64x128xf32>
    %56 = vector.extract_strided_slice %27 {offsets = [5, 0], sizes = [64, 128], strides = [1, 1]} : vector<72x128xf32> to vector<64x128xf32>
    %57 = vector.extract_strided_slice %28 {offsets = [5, 0], sizes = [1, 128], strides = [1, 1]} : vector<8x128xf32> to vector<1x128xf32>
    %58 = vector.broadcast %57 : vector<1x128xf32> to vector<64x128xf32>
    %59 = arith.mulf %56, %58 : vector<64x128xf32>
    %60 = arith.addf %55, %59 : vector<64x128xf32>
    %61 = vector.extract_strided_slice %27 {offsets = [6, 0], sizes = [64, 128], strides = [1, 1]} : vector<72x128xf32> to vector<64x128xf32>
    %62 = vector.extract_strided_slice %28 {offsets = [6, 0], sizes = [1, 128], strides = [1, 1]} : vector<8x128xf32> to vector<1x128xf32>
    %63 = vector.broadcast %62 : vector<1x128xf32> to vector<64x128xf32>
    %64 = arith.mulf %61, %63 : vector<64x128xf32>
    %65 = arith.addf %60, %64 : vector<64x128xf32>
    %cst = arith.constant 1.000000e+00 : f32
    %66 = vector.broadcast %cst : f32 to vector<128x1xf32>
    %cst_15 = arith.constant dense<0.000000e+00> : vector<64x1xf32>
    %67 = tpu.matmul %65, %66, %cst_15 {dimension_numbers = #tpu.dot_dimension_numbers<[1], [0], [0], [1], [0, 0, 1, 1], [], []>} : vector<64x128xf32>, vector<128x1xf32>, vector<64x1xf32> -> vector<64x1xf32>
    %cst_16 = arith.constant 7.812500e-03 : f32
    %68 = vector.broadcast %cst_16 : f32 to vector<64x1xf32>
    %69 = arith.mulf %67, %68 : vector<64x1xf32>
    %70 = vector.broadcast %69 : vector<64x1xf32> to vector<64x128xf32>
    %71 = arith.subf %65, %70 : vector<64x128xf32>
    %72 = arith.mulf %71, %71 : vector<64x128xf32>
    %cst_17 = arith.constant dense<0.000000e+00> : vector<64x1xf32>
    %73 = tpu.matmul %72, %66, %cst_17 {dimension_numbers = #tpu.dot_dimension_numbers<[1], [0], [0], [1], [0, 0, 1, 1], [], []>} : vector<64x128xf32>, vector<128x1xf32>, vector<64x1xf32> -> vector<64x1xf32>
    %cst_18 = arith.constant 7.812500e-03 : f32
    %74 = vector.broadcast %cst_18 : f32 to vector<64x1xf32>
    %75 = arith.mulf %73, %74 : vector<64x1xf32>
    %cst_19 = arith.constant 9.99999997E-7 : f32
    %76 = vector.broadcast %cst_19 : f32 to vector<64x1xf32>
    %77 = arith.addf %75, %76 : vector<64x1xf32>
    %78 = math.rsqrt %77 : vector<64x1xf32>
    %79 = vector.broadcast %78 : vector<64x1xf32> to vector<64x128xf32>
    %80 = arith.mulf %71, %79 : vector<64x128xf32>
    %c0_20 = arith.constant 0 : index
    %c0_21 = arith.constant 0 : index
    %81 = vector.load %arg5[%c0_20, %c0_21] : memref<1x128xf32, #tpu.memory_space<vmem>>, vector<1x128xf32>
    %82 = vector.broadcast %81 : vector<1x128xf32> to vector<64x128xf32>
    %83 = arith.mulf %80, %82 : vector<64x128xf32>
    %c0_22 = arith.constant 0 : index
    %c0_23 = arith.constant 0 : index
    %84 = vector.load %arg6[%c0_22, %c0_23] : memref<1x128xf32, #tpu.memory_space<vmem>>, vector<1x128xf32>
    %85 = vector.broadcast %84 : vector<1x128xf32> to vector<64x128xf32>
    %86 = arith.addf %83, %85 : vector<64x128xf32>
    %87 = arith.truncf %86 : vector<64x128xf32> to vector<64x128xbf16>
    %c0_24 = arith.constant 0 : index
    %c0_25 = arith.constant 0 : index
    %88 = vector.load %arg7[%c0_24, %c0_25] : memref<128x384xbf16, #tpu.memory_space<vmem>>, vector<128x384xbf16>
    %cst_26 = arith.constant dense<0.000000e+00> : vector<64x384xf32>
    %89 = tpu.matmul %87, %88, %cst_26 {dimension_numbers = #tpu.dot_dimension_numbers<[1], [0], [0], [1], [0, 0, 1, 1], [], []>} : vector<64x128xbf16>, vector<128x384xbf16>, vector<64x384xf32> -> vector<64x384xf32>
    %c0_27 = arith.constant 0 : index
    %c0_28 = arith.constant 0 : index
    %90 = vector.load %arg8[%c0_27, %c0_28] : memref<1x384xf32, #tpu.memory_space<vmem>>, vector<1x384xf32>
    %91 = vector.broadcast %90 : vector<1x384xf32> to vector<64x384xf32>
    %92 = arith.addf %89, %91 : vector<64x384xf32>
    %93 = arith.mulf %92, %92 : vector<64x384xf32>
    %94 = arith.mulf %92, %93 : vector<64x384xf32>
    %cst_29 = arith.constant 4.471500e-02 : f32
    %95 = vector.broadcast %cst_29 : f32 to vector<64x384xf32>
    %96 = arith.mulf %95, %94 : vector<64x384xf32>
    %97 = arith.addf %92, %96 : vector<64x384xf32>
    %cst_30 = arith.constant 0.797884583 : f32
    %98 = vector.broadcast %cst_30 : f32 to vector<64x384xf32>
    %99 = arith.mulf %98, %97 : vector<64x384xf32>
    %100 = math.tanh %99 : vector<64x384xf32>
    %cst_31 = arith.constant 1.000000e+00 : f32
    %101 = vector.broadcast %cst_31 : f32 to vector<64x384xf32>
    %102 = arith.addf %101, %100 : vector<64x384xf32>
    %cst_32 = arith.constant 5.000000e-01 : f32
    %103 = vector.broadcast %cst_32 : f32 to vector<64x384xf32>
    %104 = arith.mulf %103, %102 : vector<64x384xf32>
    %105 = arith.mulf %92, %104 : vector<64x384xf32>
    %106 = arith.truncf %105 : vector<64x384xf32> to vector<64x384xbf16>
    %c0_33 = arith.constant 0 : index
    %c0_34 = arith.constant 0 : index
    %107 = vector.load %arg9[%c0_33, %c0_34] : memref<384x128xbf16, #tpu.memory_space<vmem>>, vector<384x128xbf16>
    %cst_35 = arith.constant dense<0.000000e+00> : vector<64x128xf32>
    %108 = tpu.matmul %106, %107, %cst_35 {dimension_numbers = #tpu.dot_dimension_numbers<[1], [0], [0], [1], [0, 0, 1, 1], [], []>} : vector<64x384xbf16>, vector<384x128xbf16>, vector<64x128xf32> -> vector<64x128xf32>
    %c0_36 = arith.constant 0 : index
    %c0_37 = arith.constant 0 : index
    %109 = vector.load %arg10[%c0_36, %c0_37] : memref<1x128xf32, #tpu.memory_space<vmem>>, vector<1x128xf32>
    %110 = vector.broadcast %109 : vector<1x128xf32> to vector<64x128xf32>
    %111 = arith.addf %108, %110 : vector<64x128xf32>
    %c0_38 = arith.constant 0 : index
    %c0_39 = arith.constant 0 : index
    %112 = vector.load %arg11[%c0_38, %c0_39] : memref<1x128xf32, #tpu.memory_space<vmem>>, vector<1x128xf32>
    %113 = vector.broadcast %112 : vector<1x128xf32> to vector<64x128xf32>
    %114 = arith.mulf %111, %113 : vector<64x128xf32>
    %115 = arith.addf %46, %114 : vector<64x128xf32>
    %c0_40 = arith.constant 0 : index
    %c0_41 = arith.constant 0 : index
    %c0_42 = arith.constant 0 : index
    %116 = vector.load %arg12[%c0_40, %c0_41, %c0_42] : memref<1x64x128xf32, #tpu.memory_space<vmem>>, vector<1x64x128xf32>
    %117 = vector.shape_cast %116 : vector<1x64x128xf32> to vector<64x128xf32>
    %118 = vector.shape_cast %115 : vector<64x128xf32> to vector<1x64x128xf32>
    tpu.vector_store %arg12[%c0_40, %c0_41, %c0_42], %118 {strides = array<i32>} : memref<1x64x128xf32, #tpu.memory_space<vmem>>, vector<1x64x128xf32>,
    return
  }
  func.func @transform_1(%arg0: i32, %arg1: i32) -> (i32, i32) {
    %c0_i32 = arith.constant 0 : i32
    %c0_i32_0 = arith.constant 0 : i32
    %c0_i32_1 = arith.constant 0 : i32
    return %c0_i32, %c0_i32_0 : i32, i32
  }
  func.func @transform_2(%arg0: i32, %arg1: i32) -> (i32, i32) {
    %c0_i32 = arith.constant 0 : i32
    %c0_i32_0 = arith.constant 0 : i32
    %c0_i32_1 = arith.constant 0 : i32
    return %c0_i32, %c0_i32_0 : i32, i32
  }
  func.func @transform_3(%arg0: i32, %arg1: i32) -> (i32, i32) {
    %c0_i32 = arith.constant 0 : i32
    %c0_i32_0 = arith.constant 0 : i32
    %c0_i32_1 = arith.constant 0 : i32
    return %c0_i32, %c0_i32_0 : i32, i32
  }
  func.func @transform_4(%arg0: i32, %arg1: i32) -> (i32, i32) {
    %c0_i32 = arith.constant 0 : i32
    %c0_i32_0 = arith.constant 0 : i32
    %c0_i32_1 = arith.constant 0 : i32
    return %c0_i32, %c0_i32_0 : i32, i32
  }
  func.func @transform_5(%arg0: i32, %arg1: i32) -> (i32, i32) {
    %c0_i32 = arith.constant 0 : i32
    %c0_i32_0 = arith.constant 0 : i32
    %c0_i32_1 = arith.constant 0 : i32
    return %c0_i32, %c0_i32_0 : i32, i32
  }
  func.func @transform_6(%arg0: i32, %arg1: i32) -> (i32, i32) {
    %c0_i32 = arith.constant 0 : i32
    %c0_i32_0 = arith.constant 0 : i32
    %c0_i32_1 = arith.constant 0 : i32
    return %c0_i32, %c0_i32_0 : i32, i32
  }
  func.func @transform_7(%arg0: i32, %arg1: i32) -> (i32, i32) {
    %c0_i32 = arith.constant 0 : i32
    %c0_i32_0 = arith.constant 0 : i32
    %c0_i32_1 = arith.constant 0 : i32
    return %c0_i32, %c0_i32_0 : i32, i32
  }
  func.func @transform_8(%arg0: i32, %arg1: i32) -> (i32, i32) {
    %c0_i32 = arith.constant 0 : i32
    %c0_i32_0 = arith.constant 0 : i32
    %c0_i32_1 = arith.constant 0 : i32
    return %c0_i32, %c0_i32_0 : i32, i32
  }
  func.func @transform_9(%arg0: i32, %arg1: i32) -> (i32, i32) {
    %c0_i32 = arith.constant 0 : i32
    %c0_i32_0 = arith.constant 0 : i32
    %c0_i32_1 = arith.constant 0 : i32
    return %c0_i32, %c0_i32_0 : i32, i32
  }
  func.func @transform_10(%arg0: i32, %arg1: i32) -> (i32, i32, i32) {
    %c0_i32 = arith.constant 0 : i32
    %c0_i32_0 = arith.constant 0 : i32
    return %arg0, %arg1, %c0_i32 : i32, i32, i32
  }
}

</mosaic_0001>

<bundles_post_ra>
// kernel: _lambda_.1
= control target key start
LH: loop header
LB: loop body
LE: loop exit
PB: predicated region body
PF: predicated region fallthrough
CT: control target
= control target key end

     0   :  { %15 = vsyncpa [#allocation5], 0  ;;  %s3948_s0 = inlined_call_operand.vmem [shape: f32[2,264,128], index: 0, kind: input, shape index: {}]   ;;  %s3949_s1 = inlined_call_operand.vmem [shape: f32[8,128], index: 1, kind: input, shape index: {}]   ;;  %s3950_s2 = inlined_call_operand.vmem [shape: f32[1,128], index: 2, kind: input, shape index: {}]   ;;  %s3951_s3 = inlined_call_operand.vmem [shape: f32[1,128], index: 3, kind: input, shape index: {}]   ;;  %s3952_s4 = inlined_call_operand.vmem [shape: f32[1,128], index: 4, kind: input, shape index: {}]   ;;  %s3953_s5 = inlined_call_operand.vmem [shape: bf16[128,384], index: 5, kind: input, shape index: {}]   ;;  %s3954_s6 = inlined_call_operand.vmem [shape: f32[1,384], index: 6, kind: input, shape index: {}]   ;;  %s3955_s7 = inlined_call_operand.vmem [shape: bf16[384,128], index: 7, kind: input, shape index: {}]   ;;  %s3956_s8 = inlined_call_operand.vmem [shape: f32[1,128], index: 8, kind: input, shape index: {}]   ;;  %s3957_s9 = inlined_call_operand.vmem [shape: f32[1,128], index: 9, kind: input, shape index: {}]   ;;  %s3958_s10 = inlined_call_operand.hbm [shape: f32[2,200,128], index: 10, kind: output, shape index: {}]  }
   0x1   :  { %17 = vsyncpa [#allocation5 + $0x1], 0  ;;  %s3038_s13 = smov 0   ;;  %s3040_s14 = smov 0  }
   0x2   :  { %s3042_s15 = smov 0   ;;  %s3044_s16 = smov 0  }
   0x3   :  { %s3046_s17 = smov 0   ;;  %s3048_s18 = smov 0  }
   0x4   :  { %s3050_s19 = smov 0   ;;  %s3052_s20 = smov 0  }
   0x5 LB: > { %3964 = sst [smem:[#allocation10_spill]] %s2968_s18  ;;  %s2308_s21 = sadd.s32 4294967295, %s2976_s20   ;;  %s2976_s20 = sphi %s3052_s20, %s23_s20   ;;  %s2972_s19 = sphi %s3050_s19, %s3976_s19   ;;  %s2968_s18 = sphi %s3048_s18, %s3975_s18   ;;  %s2964_s17 = sphi %s3046_s17, %s3974_s17   ;;  %s2960_s16 = sphi %s3044_s16, %s3973_s16   ;;  %s2956_s15 = sphi %s3042_s15, %s3979_s15   ;;  %s2952_s14 = sphi %s3040_s14, %s3978_s14   ;;  %s2948_s13 = sphi %s3038_s13, %s3977_s13  }
   0x6   : > { %3965 = sst [smem:[#allocation11_spill]] %s2972_s19  ;;  %s2309_s22 = sadd.s32 4294967294, %s2976_s20  }
   0x7   : > { %s32_s23 = sadd.s32 1, %s2968_s18  ;;  %s35_s24 = sadd.s32 1, %s2972_s19 }
   0x8   : > { %p33_p0 = scmp.ge.s32.totalorder %s32_s23, 4  ;;  %p243_p1 = scmp.ne.s32.totalorder %s2956_s15, %s2952_s14 }
   0x9   : > { %p244_p2 = scmp.eq.s32.totalorder %s2308_s21, 7  ;;  %p249_p5 = scmp.ne.s32.totalorder %s2952_s14, %s2948_s13 }
   0xa   : > { %s3981_s23 = smov (%p33_p0, %s32_s23), 0  ;;  %s3983_s24 = smov (!%p33_p0, %s35_s24), %s2972_s19 }
   0xb   : > { %3966 = sst [smem:[#allocation12_spill]] %s3981_s23  ;;  %s229_s25 = ssub.s32 %s2968_s18, %s3981_s23 }
   0xc   : > { %p3089_p3 = por %p244_p2, %p243_p1  ;;  %p37_p4 = scmp.ge.s32.totalorder %s3983_s24, 2 }
   0xd   : > { %p250_p6 = scmp.eq.s32.totalorder %s2309_s22, 7  ;;  %p2311_p7 = scmp.ge.s32.totalorder %s2976_s20, 1 }
   0xe   : > { %s3985_s24 = smov (%p37_p4, %s3983_s24), 0  ;;  %p295_p9 = scmp.lt.s32.totalorder %s2976_s20, 9 }
   0xf   : > { %3968 = sst [smem:[#allocation13_spill]] %s3985_s24  ;;  %p3098_p8 = por %p250_p6, %p249_p5 }
  0x10   : > { %s228_s28 = ssub.s32 %s2972_s19, %s3985_s24  ;;  %s233_s29 = sadd.s32 1, %s2956_s15 }
  0x11   : > { %s230_s30 = sor.u32 %s229_s25, %s228_s28  ;;  %p296_p10 = pnand %p2311_p7, %p295_p9 }
  0x12   : > { %p231_p11 = scmp.eq.s32.totalorder %s230_s30, 0  ;;  %s3963_s12 = sand.u32 (!%p296_p10), 1, %s2952_s14  }
  0x13   : > { %299 = sbr.rel (%p296_p10) target bundleno = 1357 (0x54d), region = 56  ;;  %p332_p12 = scmp.lt.s32.totalorder (!%p296_p10), %s2960_s16, 0 }
  0x14   : > { %s3107_s11 = scalar_select %p231_p11, %s2956_s15, %s233_s29  }
  0x15   : > { %s2312_s21 = sshll.u32 (!%p296_p10), %s3963_s12, 6  ;;  %s333_s22 = ssub.s32 (!%p296_p10), 0, %s2960_s16 }
  0x16   : > { %3970 = sst [smem:[#allocation14_spill]] %s3107_s11  ;;  %s2313_s23 = smin.u32 (!%p296_p10), %s2960_s16, %s333_s22 }
  0x17   : > { %s335_s18 = sand.u32 (!%p296_p10), 1, %s2313_s23   ;;  %s3117_s28 = scalar_lea.vmem (!%p296_p10), [#allocation4], %s2312_s21 }
  0x18   : > { %s336_s24 = ssub.s32 (!%p296_p10), 0, %s335_s18  ;;  %p2316_p0 = scmp.ne.s32.totalorder (!%p296_p10), %s2960_s16, 0 }
  0x1a   : > { %s3987_s24 = smov (!%p332_p12, %s336_s24), %s335_s18  ;;  %347 = sbr.rel (%p2316_p0) target bundleno = 39 (0x27), region = 60 }
  0x1b   : > { %p2315_p13 = scmp.lt.s32.totalorder %s3987_s24, 0  ;;  %s342_s25 = sadd.s32 2, %s3987_s24 }
  0x1c   : > { %s2317_s29 = sshll.u32 (!%p2316_p0), %s2960_s16, 6  ;;  %s349_s30 = smul.u32 (!%p2316_p0), 264, %s2964_s17 }
  0x1d   : > { %s3989_s25 = smov (!%p2315_p13, %s342_s25), %s3987_s24 }
  0x1e   : > { %s350_s19 = sadd.s32 (!%p2316_p0), %s2317_s29, %s349_s30 }
  0x1f   : > { %s351_s23 = scalar_lea.vmem (!%p2316_p0), %s3948_s0, %s350_s19 }
  0x20   : > { %v384_v0 = vld [vmem:[%s351_s23] sm:$0xff] (!%p2316_p0)  ;;  %v386_v1 = vld [vmem:[%s351_s23 + $0x8] sm:$0xff] (!%p2316_p0)  ;;  %v388_v2 = vld [vmem:[%s351_s23 + $0x10] sm:$0xff] (!%p2316_p0) }
  0x21   : > { %385 = vst [vmem:[#allocation2] sm:$0xff] %v384_v0  ;;  %387 = vst [vmem:[#allocation2 + $0x8] sm:$0xff] %v386_v1  ;;  %v390_v3 = vld [vmem:[%s351_s23 + $0x18] sm:$0xff]  ;;  %v392_v4 = vld [vmem:[%s351_s23 + $0x20] sm:$0xff] }
  0x22   : > { %389 = vst [vmem:[#allocation2 + $0x10] sm:$0xff] %v388_v2  ;;  %v394_v5 = vld [vmem:[%s351_s23 + $0x28] sm:$0xff]  ;;  %391 = vst [vmem:[#allocation2 + $0x18] sm:$0xff] %v390_v3  ;;  %v396_v6 = vld [vmem:[%s351_s23 + $0x30] sm:$0xff] }
  0x23   : > { %393 = vst [vmem:[#allocation2 + $0x20] sm:$0xff] %v392_v4  ;;  %395 = vst [vmem:[#allocation2 + $0x28] sm:$0xff] %v394_v5  ;;  %v398_v7 = vld [vmem:[%s351_s23 + $0x38] sm:$0xff]  ;;  %v400_v8 = vld [vmem:[%s351_s23 + $0x40] sm:$0xff] }
  0x24   : > { %397 = vst [vmem:[#allocation2 + $0x30] sm:$0xff] %v396_v6  ;;  %399 = vst [vmem:[#allocation2 + $0x38] sm:$0xff] %v398_v7 }
  0x25   : > { %401 = vst [vmem:[#allocation2 + $0x40] sm:$0xff] %v400_v8 }
  0x26   : > { %409 = vsyncadd [#allocation3], 1152 }
  0x27 PF: > { %s410_s18 = sadd.s32 1, %s2960_s16 }
  0x28   : > { %p2318_p1 = scmp.ge.s32.totalorder %s410_s18, 4 }
  0x29   : > { %s415_s19 = ssub.s32 (!%p2318_p1), 1, %s3989_s25  ;;  %s2319_s24 = sshll.u32 (!%p2318_p1), %s2960_s16, 6 }
  0x2a   : > { %414 = sbr.rel (%p2318_p1) target bundleno = 54 (0x36), region = 98  ;;  %s422_s18 = scalar_lea.sflag (!%p2318_p1), [#allocation3], %s415_s19 }
  0x2b   : > { %s2245_s11 = smul.u32 (!%p2318_p1), 264, %s2964_s17 }
  0x2c   : > { %s420_s12 = smul.u32 (!%p2318_p1), 72, %s415_s19 }
  0x2d   : > { %s2246_s21 = sadd.s32 (!%p2318_p1), %s2319_s24, %s2245_s11 }
  0x2e   : > { %s2247_s30 = scalar_lea.vmem (!%p2318_p1), %s3948_s0, %s2246_s21  ;;  %s421_s23 = scalar_lea.vmem (!%p2318_p1), [#allocation2], %s420_s12 }
  0x2f   : > { %v2320_v9 = vld [vmem:[%s2247_s30 + $0x40] sm:$0xff] (!%p2318_p1)  ;;  %v2321_v10 = vld [vmem:[%s2247_s30 + $0x48] sm:$0xff] (!%p2318_p1)  ;;  %v2322_v11 = vld [vmem:[%s2247_s30 + $0x50] sm:$0xff] (!%p2318_p1) }
  0x30   : > { %456 = vst [vmem:[%s421_s23] sm:$0xff] (!%p2318_p1), %v2320_v9  ;;  %458 = vst [vmem:[%s421_s23 + $0x8] sm:$0xff] (!%p2318_p1), %v2321_v10  ;;  %v2323_v12 = vld [vmem:[%s2247_s30 + $0x58] sm:$0xff] (!%p2318_p1)  ;;  %v2324_v13 = vld [vmem:[%s2247_s30 + $0x60] sm:$0xff] (!%p2318_p1) }
  0x31   : > { %460 = vst [vmem:[%s421_s23 + $0x10] sm:$0xff] %v2322_v11  ;;  %v2325_v14 = vld [vmem:[%s2247_s30 + $0x68] sm:$0xff]  ;;  %462 = vst [vmem:[%s421_s23 + $0x18] sm:$0xff] %v2323_v12  ;;  %v2326_v15 = vld [vmem:[%s2247_s30 + $0x70] sm:$0xff] }
  0x32   : > { %464 = vst [vmem:[%s421_s23 + $0x20] sm:$0xff] %v2324_v13  ;;  %466 = vst [vmem:[%s421_s23 + $0x28] sm:$0xff] %v2325_v14  ;;  %v2327_v16 = vld [vmem:[%s2247_s30 + $0x78] sm:$0xff]  ;;  %v2328_v17 = vld [vmem:[%s2247_s30 + $0x80] sm:$0xff] }
  0x33   : > { %468 = vst [vmem:[%s421_s23 + $0x30] sm:$0xff] %v2326_v15  ;;  %470 = vst [vmem:[%s421_s23 + $0x38] sm:$0xff] %v2327_v16 }
  0x34   : > { %472 = vst [vmem:[%s421_s23 + $0x40] sm:$0xff] %v2328_v17 }
  0x35   : > { %480 = vsyncadd %s422_s18, 1152 }
  0x36 PF: > { %s482_s24 = smul.u32 72, %s3989_s25  ;;  %s484_s12 = scalar_lea.sflag [#allocation3], %s3989_s25 }
  0x38   : > { %s3133_s11 = scalar_lea.vmem [#allocation2], %s482_s24 }
  0x39   : > { %2940 = dma.done.wait %s484_s12, 1152 }
  0x3a   : > { %2941 = vsyncadd %s484_s12, 4294966144  ;;  %v499_v18 = vlaneseq  ;;  %v2978_v19 = vmov 1.0|1.0   ;;  %vm547_vm0 = vcmask 1046528   ;;  %vm603_vm1 = vcmask 1045504   ;;  %v497_v30 = vld [vmem:[%s3949_s1] sm:$0xff] }
  0x3b   : > { %2642 = vmatprep.subr.bf16.mxu0 %v2978_v19  ;;  %2658 = vmatprep.subr.bf16.mxu1 %v2978_v19  ;;  %vm659_vm2 = vcmask 1044480   ;;  %vm715_vm3 = vcmask 1043456   ;;  %vm771_vm4 = vcmask 1042432   ;;  %v3177_v35 = vld [vmem:[%s3950_s2] ss:$0 sm:$0xff]  ;;  %vm827_vm5 = vcmask 1041408  }
  0x3c   : > { %2643 = vmatpush3.bf16.msra.mxu0 %v2978_v19  ;;  %v3139_v20 = vshrl.u32 %v499_v18, 7  ;;  %2659 = vmatpush3.bf16.msra.mxu1 %v2978_v19  ;;  %v490_v51 = vld [vmem:[%s3133_s11 + $0x10] sm:$0xff]  ;;  %s3971_s25 = sand.u32 1, %s2952_s14   ;;  %s2384_s21 = sshll.u32 (%p3089_p3), %s2960_s16, 3 }
  0x3d   : > { %2644 = vmatprep.subr.bf16.mxu0 %v2978_v19  ;;  %2660 = vmatprep.subr.bf16.mxu1 %v2978_v19  ;;  %v488_v28 = vld [vmem:[%s3133_s11] sm:$0xff]  ;;  %v489_v29 = vld [vmem:[%s3133_s11 + $0x8] sm:$0xff]  ;;  %s3876_s19 = scalar_lea.sflag [#allocation5], %s3971_s25  ;;  %s2187_s22 = ssub.s32 (%p3089_p3), 25, %s2384_s21 }
  0x3e   : > { %v501_v21 = vsub.s32 0, %v3139_v20  ;;  %v527_v22 = vsub.s32 1, %v3139_v20  ;;  %v583_v23 = vsub.s32 2, %v3139_v20  ;;  %v639_v24 = vsub.s32 3, %v3139_v20  ;;  %p2188_p2 = scmp.lt.s32.totalorder (%p3089_p3), %s2187_s22, 8 }
  0x3f   : > { %v695_v25 = vsub.s32 4, %v3139_v20  ;;  %v751_v26 = vsub.s32 5, %v3139_v20  ;;  %v807_v27 = vsub.s32 6, %v3139_v20 }
  0x40   : > { %2645 = vmatpush3.bf16.msra.mxu0 %v2978_v19  ;;  %2661 = vmatpush3.bf16.msra.mxu1 %v2978_v19  ;;  %v3162_v31 = vrot.slane %v497_v30, %v501_v21  ;;  %v3166_v32 = vrot.slane %v497_v30, %v527_v22  ;;  %v3170_v33 = vrot.slane %v497_v30, %v583_v23 }
  0x41   : > { %2646 = vmatprep.subr.bf16.mxu0 %v2978_v19  ;;  %2662 = vmatprep.subr.bf16.mxu1 %v2978_v19  ;;  %v3172_v34 = vrot.slane %v497_v30, %v639_v24  ;;  %v3179_v36 = vrot.slane %v497_v30, %v695_v25  ;;  %v3181_v37 = vrot.slane %v497_v30, %v751_v26 }
  0x42   : > { %v3183_v38 = vrot.slane %v497_v30, %v807_v27  ;;  %v503_v39 = vmul.f32 %v3162_v31, %v488_v28  ;;  %v529_v40 = vmul.f32 %v3166_v32, %v488_v28  ;;  %v530_v41 = vmul.f32 %v3166_v32, %v489_v29 }
  0x43   : > { %v585_v42 = vmul.f32 %v3170_v33, %v488_v28  ;;  %v586_v43 = vmul.f32 %v3170_v33, %v489_v29  ;;  %v641_v44 = vmul.f32 %v3172_v34, %v488_v28  ;;  %v3194_v45 = vmul.f32 %v3172_v34, %v489_v29 }
  0x44   : > { %2647 = vmatpush3.bf16.msra.mxu0 %v2978_v19  ;;  %v697_v46 = vmul.f32 %v3179_v36, %v488_v28  ;;  %v517_v47 = vadd.f32 %v3177_v35, %v503_v39  ;;  %v548_v48 = vrot.slane %v529_v40, 1  ;;  %v549_v49 = vrot.slane %v530_v41, 1  ;;  %2663 = vmatpush3.bf16.msra.mxu1 %v2978_v19 }
  0x45   : > { %2648 = vmatprep.subr.bf16.mxu0 %v2978_v19  ;;  %v604_v50 = vrot.slane %v585_v42, 2  ;;  %v605_v52 = vrot.slane %v586_v43, 2  ;;  %v660_v53 = vrot.slane %v641_v44, 3  ;;  %v661_v54 = vrot.slane %v3194_v45, 3  ;;  %2664 = vmatprep.subr.bf16.mxu1 %v2978_v19 }
  0x46   : > { %v698_v55 = vmul.f32 %v3179_v36, %v489_v29  ;;  %v550_v56 = vsel %vm547_vm0, %v548_v48, %v549_v49  ;;  %v716_v57 = vrot.slane %v697_v46, 4  ;;  %v753_v58 = vmul.f32 %v3181_v37, %v488_v28 }
  0x47   : > { %v754_v59 = vmul.f32 %v3181_v37, %v489_v29  ;;  %v573_v60 = vadd.f32 %v550_v56, %v517_v47  ;;  %v606_v61 = vsel %vm603_vm1, %v604_v50, %v605_v52  ;;  %v662_v62 = vsel %vm659_vm2, %v660_v53, %v661_v54 }
  0x48   : > { %2649 = vmatpush3.bf16.msra.mxu0 %v2978_v19  ;;  %v717_v63 = vrot.slane %v698_v55, 4  ;;  %v772_v0 = vrot.slane %v753_v58, 5  ;;  %v809_v2 = vmul.f32 %v3183_v38, %v488_v28  ;;  %v810_v3 = vmul.f32 %v3183_v38, %v489_v29  ;;  %2665 = vmatpush3.bf16.msra.mxu1 %v2978_v19 }
  0x49   : > { %2650 = vmatprep.subr.bf16.mxu0 %v2978_v19  ;;  %v773_v1 = vrot.slane %v754_v59, 5  ;;  %v629_v4 = vadd.f32 %v606_v61, %v573_v60  ;;  %v504_v6 = vmul.f32 %v3162_v31, %v489_v29  ;;  %v531_v7 = vmul.f32 %v3166_v32, %v490_v51  ;;  %2666 = vmatprep.subr.bf16.mxu1 %v2978_v19  ;;  %v491_v29 = vld [vmem:[%s3133_s11 + $0x18] sm:$0xff]  ;;  %v492_v61 = vld [vmem:[%s3133_s11 + $0x20] sm:$0xff] }
  0x4a   : > { %v718_v5 = vsel %vm715_vm3, %v716_v57, %v717_v63  ;;  %v828_v9 = vrot.slane %v809_v2, 6  ;;  %v829_v10 = vrot.slane %v810_v3, 6  ;;  %v587_v11 = vmul.f32 %v3170_v33, %v490_v51 }
  0x4b   : > { %v774_v8 = vsel %vm771_vm4, %v772_v0, %v773_v1  ;;  %v685_v12 = vadd.f32 %v662_v62, %v629_v4  ;;  %v518_v13 = vadd.f32 %v3177_v35, %v504_v6  ;;  %v551_v14 = vrot.slane %v531_v7, 1 }
  0x4c   : > { %2651 = vmatpush3.bf16.msra.mxu0 %v2978_v19  ;;  %v643_v15 = vmul.f32 %v3172_v34, %v490_v51  ;;  %v830_v16 = vsel %vm827_vm5, %v828_v9, %v829_v10  ;;  %v607_v17 = vrot.slane %v587_v11, 2  ;;  %v699_v18 = vmul.f32 %v3179_v36, %v490_v51  ;;  %2667 = vmatpush3.bf16.msra.mxu1 %v2978_v19 }
  0x4d   : > { %2652 = vmatprep.subr.bf16.mxu0 %v2978_v19  ;;  %v755_v24 = vmul.f32 %v3181_v37, %v490_v51  ;;  %v741_v25 = vadd.f32 %v718_v5, %v685_v12  ;;  %v552_v26 = vsel %vm547_vm0, %v549_v49, %v551_v14  ;;  %v3229_v28 = vmul.f32 %v3183_v38, %v490_v51 }
  0x4e   : > { %v663_v27 = vrot.slane %v643_v15, 3  ;;  %2668 = vmatprep.subr.bf16.mxu1 %v2978_v19  ;;  %v574_v30 = vadd.f32 %v552_v26, %v518_v13  ;;  %v608_v39 = vsel %vm603_vm1, %v605_v52, %v607_v17  ;;  %v719_v40 = vrot.slane %v699_v18, 4 }
  0x4f   : > { %v775_v41 = vrot.slane %v755_v24, 5  ;;  %v797_v42 = vadd.f32 %v774_v8, %v741_v25  ;;  %v831_v44 = vrot.slane %v3229_v28, 6  ;;  %v505_v45 = vmul.f32 %v3162_v31, %v490_v51 }
  0x50   : > { %2653 = vmatpush3.bf16.msra.mxu0 %v2978_v19  ;;  %v664_v43 = vsel %vm659_vm2, %v661_v54, %v663_v27  ;;  %v630_v46 = vadd.f32 %v608_v39, %v574_v30  ;;  %v720_v47 = vsel %vm715_vm3, %v717_v63, %v719_v40  ;;  %v532_v49 = vmul.f32 %v3166_v32, %v491_v29  ;;  %v493_v30 = vld [vmem:[%s3133_s11 + $0x28] sm:$0xff] }
  0x51   : > { %2654 = vmatprep.subr.bf16.mxu0 %v2978_v19  ;;  %v776_v48 = vsel %vm771_vm4, %v773_v1, %v775_v41  ;;  %2669 = vmatpush3.bf16.msra.mxu1 %v2978_v19  ;;  %v3243_v50 = vadd.f32 %v830_v16, %v797_v42  ;;  %v832_v52 = vsel %vm827_vm5, %v829_v10, %v831_v44 }
  0x52   : > { %v519_v53 = vadd.f32 %v3177_v35, %v505_v45  ;;  %v588_v54 = vmul.f32 %v3170_v33, %v491_v29  ;;  %2670 = vmatprep.subr.bf16.mxu1 %v2978_v19  ;;  %v686_v51 = vadd.f32 %v664_v43, %v630_v46  ;;  %v553_v55 = vrot.slane %v532_v49, 1 }
  0x53   : > { %v644_v56 = vmul.f32 %v3172_v34, %v491_v29  ;;  %v700_v57 = vmul.f32 %v3179_v36, %v491_v29  ;;  %2538 = vmatprep.mubr.f32.mxu0 %v3243_v50  ;;  %v3255_v59 = vmul.f32 %v3181_v37, %v491_v29  ;;  %v3258_v60 = vmul.f32 %v3183_v38, %v491_v29 }
  0x54   : > { %2655 = vmatpush3.bf16.msra.mxu0 %v2978_v19  ;;  %v609_v58 = vrot.slane %v588_v54, 2  ;;  %v506_v62 = vmul.f32 %v3162_v31, %v491_v29  ;;  %v742_v63 = vadd.f32 %v720_v47, %v686_v51  ;;  %v554_v0 = vsel %vm547_vm0, %v551_v14, %v553_v55 }
  0x55   : > { %2656 = vmatprep.subr.bf16.mxu0 %v2978_v19  ;;  %v665_v1 = vrot.slane %v644_v56, 3  ;;  %v721_v2 = vrot.slane %v700_v57, 4  ;;  %2671 = vmatpush3.bf16.msra.mxu1 %v2978_v19  ;;  %v575_v3 = vadd.f32 %v554_v0, %v519_v53  ;;  %v777_v5 = vrot.slane %v3255_v59, 5 }
  0x56   : > { %v610_v4 = vsel %vm603_vm1, %v607_v17, %v609_v58  ;;  %v833_v6 = vrot.slane %v3258_v60, 6  ;;  %2672 = vmatprep.subr.bf16.mxu1 %v2978_v19  ;;  %v798_v7 = vadd.f32 %v776_v48, %v742_v63  ;;  %v520_v12 = vadd.f32 %v3177_v35, %v506_v62 }
  0x57   : > { %v666_v8 = vsel %vm659_vm2, %v663_v27, %v665_v1  ;;  %v722_v9 = vsel %vm715_vm3, %v719_v40, %v721_v2  ;;  %v631_v10 = vadd.f32 %v610_v4, %v575_v3  ;;  %v778_v11 = vsel %vm771_vm4, %v775_v41, %v777_v5 }
  0x58   : > { %2657 = vmatpush3.bf16.msra.mxu0 %v2978_v19  ;;  %v533_v13 = vmul.f32 %v3166_v32, %v492_v61  ;;  %v3274_v14 = vadd.f32 %v832_v52, %v798_v7  ;;  %v589_v15 = vmul.f32 %v3170_v33, %v492_v61  ;;  %v645_v16 = vmul.f32 %v3172_v34, %v492_v61 }
  0x59   : > { %v701_v17 = vmul.f32 %v3179_v36, %v492_v61  ;;  %2673 = vmatpush3.bf16.msra.mxu1 %v2978_v19  ;;  %v687_v18 = vadd.f32 %v666_v8, %v631_v10  ;;  %v757_v25 = vmul.f32 %v3181_v37, %v492_v61  ;;  %v3282_v26 = vmul.f32 %v3183_v38, %v492_v61 }
  0x5a   : > { %v555_v24 = vrot.slane %v533_v13, 1  ;;  %v611_v27 = vrot.slane %v589_v15, 2  ;;  %v667_v28 = vrot.slane %v645_v16, 3  ;;  %v507_v39 = vmul.f32 %v3162_v31, %v492_v61 }
  0x5b   : > { %2539 = vmatmul.mubr.f32.vlgmr.msra.gmra.mrb[0].mxu0 %v3274_v14  ;;  %v723_v29 = vrot.slane %v701_v17, 4  ;;  %v743_v40 = vadd.f32 %v722_v9, %v687_v18  ;;  %v779_v42 = vrot.slane %v757_v25, 5  ;;  %v835_v19 = vrot.slane %v3282_v26, 6 }
  0x5c   : > { %v556_v41 = vsel %vm547_vm0, %v553_v55, %v555_v24  ;;  %v834_v43 = vsel %vm827_vm5, %v831_v44, %v833_v6  ;;  %v612_v46 = vsel %vm603_vm1, %v609_v58, %v611_v27  ;;  %v668_v48 = vsel %vm659_vm2, %v665_v1, %v667_v28 }
  0x5d   : > { %v576_v45 = vadd.f32 %v556_v41, %v520_v12  ;;  %v799_v47 = vadd.f32 %v778_v11, %v743_v40  ;;  %v724_v49 = vsel %vm715_vm3, %v721_v2, %v723_v29  ;;  %v521_v52 = vadd.f32 %v3177_v35, %v507_v39  ;;  %v494_v2 = vld [vmem:[%s3133_s11 + $0x30] sm:$0xff] }
  0x5e   : > { %v534_v54 = vmul.f32 %v3166_v32, %v493_v30  ;;  %v590_v51 = vmul.f32 %v3170_v33, %v493_v30  ;;  %v646_v55 = vmul.f32 %v3172_v34, %v493_v30  ;;  %v702_v44 = vmul.f32 %v3179_v36, %v493_v30 }
  0x5f   : > { %v632_v53 = vadd.f32 %v612_v46, %v576_v45  ;;  %v3297_v56 = vadd.f32 %v834_v43, %v799_v47  ;;  %v3301_v57 = vmul.f32 %v3181_v37, %v493_v30  ;;  %v3304_v58 = vmul.f32 %v3183_v38, %v493_v30  ;;  %v495_v43 = vld [vmem:[%s3133_s11 + $0x38] sm:$0xff] }
  0x60   : > { %v557_v60 = vrot.slane %v534_v54, 1  ;;  %v613_v61 = vrot.slane %v590_v51, 2  ;;  %v669_v62 = vrot.slane %v646_v55, 3  ;;  %v780_v63 = vsel %vm771_vm4, %v777_v5, %v779_v42 }
  0x61   : > { %v688_v59 = vadd.f32 %v668_v48, %v632_v53  ;;  %2541 = vmatprep.mubr.f32.mxu0 %v3297_v56  ;;  %v725_v0 = vrot.slane %v702_v44, 4  ;;  %v781_v1 = vrot.slane %v3301_v57, 5  ;;  %v508_v3 = vmul.f32 %v3162_v31, %v493_v30 }
  0x62   : > { %v836_v7 = vsel %vm827_vm5, %v833_v6, %v835_v19  ;;  %v558_v8 = vsel %vm547_vm0, %v555_v24, %v557_v60  ;;  %v614_v9 = vsel %vm603_vm1, %v611_v27, %v613_v61  ;;  %v670_v11 = vsel %vm659_vm2, %v667_v28, %v669_v62 }
  0x63   : > { %v744_v4 = vadd.f32 %v724_v49, %v688_v59  ;;  %v577_v10 = vadd.f32 %v558_v8, %v521_v52  ;;  %v726_v12 = vsel %vm715_vm3, %v723_v29, %v725_v0  ;;  %v837_v5 = vrot.slane %v3304_v58, 6 }
  0x64   : > { %v522_v15 = vadd.f32 %v3177_v35, %v508_v3  ;;  %v535_v16 = vmul.f32 %v3166_v32, %v494_v2  ;;  %v591_v17 = vmul.f32 %v3170_v33, %v494_v2  ;;  %v647_v18 = vmul.f32 %v3172_v34, %v494_v2 }
  0x65   : > { %v800_v13 = vadd.f32 %v780_v63, %v744_v4  ;;  %v633_v6 = vadd.f32 %v614_v9, %v577_v10  ;;  %v703_v24 = vmul.f32 %v3179_v36, %v494_v2  ;;  %v3323_v25 = vmul.f32 %v3181_v37, %v494_v2 }
  0x66   : > { %v559_v27 = vrot.slane %v535_v16, 1  ;;  %v615_v28 = vrot.slane %v591_v17, 2  ;;  %v3328_v29 = vmul.f32 %v3183_v38, %v494_v2  ;;  %v782_v39 = vsel %vm771_vm4, %v779_v42, %v781_v1 }
  0x67   : > { %v3325_v26 = vadd.f32 %v836_v7, %v800_v13  ;;  %v689_v30 = vadd.f32 %v670_v11, %v633_v6  ;;  %v671_v40 = vrot.slane %v647_v18, 3  ;;  %v727_v41 = vrot.slane %v703_v24, 4  ;;  %v496_v11 = vld [vmem:[%s3133_s11 + $0x40] sm:$0xff] }
  0x68   : > { %v838_v45 = vsel %vm827_vm5, %v835_v19, %v837_v5  ;;  %v560_v46 = vsel %vm547_vm0, %v557_v60, %v559_v27  ;;  %v616_v47 = vsel %vm603_vm1, %v613_v61, %v615_v28  ;;  %v509_v48 = vmul.f32 %v3162_v31, %v494_v2 }
  0x69   : > { %2542 = vmatmul.mubr.f32.gmra.mrb[2].mxu0 %v3325_v26  ;;  %v745_v49 = vadd.f32 %v726_v12, %v689_v30  ;;  %v578_v52 = vadd.f32 %v560_v46, %v522_v15  ;;  %v783_v53 = vrot.slane %v3323_v25, 5  ;;  %v839_v54 = vrot.slane %v3328_v29, 6 }
  0x6a   : > { %v672_v42 = vsel %vm659_vm2, %v669_v62, %v671_v40  ;;  %v728_v51 = vsel %vm715_vm3, %v725_v0, %v727_v41  ;;  %v523_v55 = vadd.f32 %v3177_v35, %v509_v48  ;;  %v536_v19 = vmul.f32 %v3166_v32, %v495_v43 }
  0x6b   : > { %v801_v44 = vadd.f32 %v782_v39, %v745_v49  ;;  %v634_v57 = vadd.f32 %v616_v47, %v578_v52  ;;  %v592_v58 = vmul.f32 %v3170_v33, %v495_v43  ;;  %v648_v59 = vmul.f32 %v3172_v34, %v495_v43 }
  0x6c   : > { %v561_v60 = vrot.slane %v536_v19, 1  ;;  %v704_v61 = vmul.f32 %v3179_v36, %v495_v43  ;;  %v760_v63 = vmul.f32 %v3181_v37, %v495_v43  ;;  %v816_v62 = vmul.f32 %v3183_v38, %v495_v43 }
  0x6d   : > { %v3348_v2 = vadd.f32 %v838_v45, %v801_v44  ;;  %v690_v0 = vadd.f32 %v672_v42, %v634_v57  ;;  %v617_v3 = vrot.slane %v592_v58, 2  ;;  %v673_v4 = vrot.slane %v648_v59, 3 }
  0x6e   : > { %v784_v7 = vsel %vm771_vm4, %v781_v1, %v783_v53  ;;  %v840_v8 = vsel %vm827_vm5, %v837_v5, %v839_v54  ;;  %v562_v9 = vsel %vm547_vm0, %v559_v27, %v561_v60  ;;  %v729_v10 = vrot.slane %v704_v61, 4 }
  0x6f   : > { %2544 = vmatprep.mubr.f32.mxu0 %v3348_v2  ;;  %v746_v12 = vadd.f32 %v728_v51, %v690_v0  ;;  %v579_v13 = vadd.f32 %v562_v9, %v523_v55  ;;  %v618_v15 = vsel %vm603_vm1, %v615_v28, %v617_v3  ;;  %v785_v16 = vrot.slane %v760_v63, 5 }
  0x70   : > { %v674_v17 = vsel %vm659_vm2, %v671_v40, %v673_v4  ;;  %v730_v6 = vsel %vm715_vm3, %v727_v41, %v729_v10  ;;  %v841_v18 = vrot.slane %v816_v62, 6  ;;  %v510_v1 = vmul.f32 %v3162_v31, %v495_v43 }
  0x71   : > { %v802_v24 = vadd.f32 %v784_v7, %v746_v12  ;;  %v635_v5 = vadd.f32 %v618_v15, %v579_v13  ;;  %v537_v25 = vmul.f32 %v3166_v32, %v496_v11  ;;  %v593_v27 = vmul.f32 %v3170_v33, %v496_v11 }
  0x72   : > { %v524_v29 = vadd.f32 %v3177_v35, %v510_v1  ;;  %v649_v30 = vmul.f32 %v3172_v34, %v496_v11  ;;  %v705_v28 = vmul.f32 %v3179_v36, %v496_v11  ;;  %v761_v39 = vmul.f32 %v3181_v37, %v496_v11 }
  0x73   : > { %v3365_v40 = vadd.f32 %v840_v8, %v802_v24  ;;  %v691_v41 = vadd.f32 %v674_v17, %v635_v5  ;;  %v563_v45 = vrot.slane %v537_v25, 1  ;;  %v619_v46 = vrot.slane %v593_v27, 2 }
  0x74   : > { %v786_v31 = vsel %vm771_vm4, %v783_v53, %v785_v16  ;;  %v675_v43 = vrot.slane %v649_v30, 3  ;;  %v731_v47 = vrot.slane %v705_v28, 4  ;;  %v817_v35 = vmul.f32 %v3183_v38, %v496_v11 }
  0x75   : > { %2545 = vmatmul.mubr.f32.gmra.mrb[4].mxu0 %v3365_v40  ;;  %v747_v32 = vadd.f32 %v730_v6, %v691_v41  ;;  %v564_v33 = vsel %vm547_vm0, %v561_v60, %v563_v45  ;;  %v620_v34 = vsel %vm603_vm1, %v617_v3, %v619_v46  ;;  %v842_v36 = vsel %vm827_vm5, %v839_v54, %v841_v18 }
  0x76   : > { %v580_v37 = vadd.f32 %v564_v33, %v524_v29  ;;  %v676_v49 = vsel %vm659_vm2, %v673_v4, %v675_v43  ;;  %v787_v52 = vrot.slane %v761_v39, 5  ;;  %v732_v51 = vsel %vm715_vm3, %v729_v10, %v731_v47  ;;  %v2753_v33 = vld [vmem:[%s3953_s5 + $0x4] ss:$12 sps:$4 sm:$0xff]  }
  0x77   : > { %v803_v48 = vadd.f32 %v786_v31, %v747_v32  ;;  %v843_v55 = vrot.slane %v817_v35, 6  ;;  %v2979_v59 = vmov 0   ;;  %v2751_v32 = vld [vmem:[%s3953_s5] ss:$12 sps:$4 sm:$0xff]   ;;  %v2757_v35 = vld [vmem:[%s3953_s5 + $0x8] ss:$12 sps:$4 sm:$0xff]   ;;  %1418 = vmatprep.subr.bf16.mxu0 %v2753_v33 }
  0x78   : > { %v636_v42 = vadd.f32 %v620_v34, %v580_v37  ;;  %v788_v44 = vsel %vm771_vm4, %v785_v16, %v787_v52  ;;  %2749 = vset.pattern.permute.xlu0 %v2979_v59  ;;  %2750 = vset.pattern.permute.xlu1 %v2979_v59  ;;  %v2756_v34 = vld [vmem:[%s3953_s5 + $0x1c] ss:$12 sps:$4 sm:$0xff]   ;;  %v2754_v37 = vld [vmem:[%s3953_s5 + $0x18] ss:$12 sps:$4 sm:$0xff]  }
  0x79   : > { %v3374_v53 = vadd.f32 %v842_v36, %v803_v48  ;;  %v844_v38 = vsel %vm827_vm5, %v841_v18, %v843_v55  ;;  %v2761_v36 = vld [vmem:[%s3953_s5 + $0x20] ss:$12 sps:$4 sm:$0xff]   ;;  %1419 = vmatpush1.bf16.msra.mxu0 %v2751_v32  ;;  %2594 = vmatprep.subr.bf16.mxu1 %v2757_v35  ;;  %v2758_v52 = vld [vmem:[%s3953_s5 + $0x30] ss:$12 sps:$4 sm:$0xff]  }
  0x7a   : > { %v692_v19 = vadd.f32 %v676_v49, %v636_v42  ;;  %1420 = vmatprep.subr.bf16.mxu0 %v2756_v34  ;;  %v2760_v48 = vld [vmem:[%s3953_s5 + $0x34] ss:$12 sps:$4 sm:$0xff]   ;;  %v2765_v49 = vld [vmem:[%s3953_s5 + $0x38] ss:$12 sps:$4 sm:$0xff]   ;;  %v2782_v34 = vld [vmem:[%s3953_s5 + $0xb0] ss:$12 sps:$4 sm:$0xff]  }
  0x7b   : > { %2547 = vmatprep.mubr.f32.mxu0 %v3374_v53  ;;  %v2764_v42 = vld [vmem:[%s3953_s5 + $0x4c] ss:$12 sps:$4 sm:$0xff]   ;;  %v2768_v55 = vld [vmem:[%s3953_s5 + $0x64] ss:$12 sps:$4 sm:$0xff]  }
  0x7c   : > { %v748_v57 = vadd.f32 %v732_v51, %v692_v19  ;;  %v2762_v51 = vld [vmem:[%s3953_s5 + $0x48] ss:$12 sps:$4 sm:$0xff]  }
  0x7d   : > { %1421 = vmatpush1.bf16.msra.mxu0 %v2754_v37  ;;  %v2773_v19 = vld [vmem:[%s3953_s5 + $0x68] ss:$12 sps:$4 sm:$0xff]   ;;  %v2331_v37 = vld [vmem:[%s3951_s3] ss:$0 sm:$0xff] }
  0x7e   : > { %v804_v54 = vadd.f32 %v788_v44, %v748_v57  ;;  %1422 = vmatprep.subr.bf16.mxu0 %v2760_v48  ;;  %v2766_v44 = vld [vmem:[%s3953_s5 + $0x60] ss:$12 sps:$4 sm:$0xff]   ;;  %v2772_v57 = vld [vmem:[%s3953_s5 + $0x7c] ss:$12 sps:$4 sm:$0xff]  }
  0x80   : > { %v860_v58 = vadd.f32 %v844_v38, %v804_v54  ;;  %v2770_v38 = vld [vmem:[%s3953_s5 + $0x78] ss:$12 sps:$4 sm:$0xff]  }
  0x81   : > { %1423 = vmatpush1.bf16.msra.mxu0 %v2758_v52 }
  0x82   : > { %2548 = vmatmul.mubr.f32.gmra.mrb[6].mxu0 %v860_v58  ;;  %1424 = vmatprep.subr.bf16.mxu0 %v2764_v42  ;;  %v2332_v42 = vld [vmem:[%s3952_s4] ss:$0 sm:$0xff] }
  0x83   : > { %1450 = vmatprep.mubr.bf16.mxu0 %v2979_v59 }
  0x85   : > { %1425 = vmatpush1.bf16.msra.mxu0 %v2762_v51 }
  0x86   : > { %1426 = vmatprep.subr.bf16.mxu0 %v2768_v55 }
  0x89   : > { %1427 = vmatpush1.bf16.msra.mxu0 %v2766_v44 }
  0x8a   : > { %1428 = vmatprep.subr.bf16.mxu0 %v2772_v57 }
  0x8d   : > { %1429 = vmatpush1.bf16.msra.mxu0 %v2770_v38 }
 0x12e   : > { %v2540_v60 = vpop.f32.mrb[0].mxu0 }
 0x12f   : > { %v927_v61 = vpop.f32.mrb[1].mxu0  ;;  %v967_v62 = vmul.f32 0.0078125, %v2540_v60 }
 0x130   : > { %v966_v63 = vmul.f32 0.0078125, %v927_v61 }
 0x132   : > { %976 = vperm.xlu0 %2749, %v966_v63  }
 0x136   : > { %981 = vperm.xlu0 %2749, %v967_v62  }
 0x13c   : > { %v2543_v0 = vpop.f32.mrb[2].mxu0 }
 0x13d   : > { %v937_v3 = vpop.f32.mrb[3].mxu0  ;;  %v969_v7 = vmul.f32 0.0078125, %v2543_v0 }
 0x13e   : > { %v968_v4 = vmul.f32 0.0078125, %v937_v3 }
 0x140   : > { %986 = vperm.xlu1 %2750, %v968_v4  }
 0x144   : > { %991 = vperm.xlu1 %2750, %v969_v7  }
 0x148   : > { %v2546_v8 = vpop.f32.mrb[4].mxu0 }
 0x149   : > { %v971_v9 = vmul.f32 0.0078125, %v2546_v8  ;;  %v947_v10 = vpop.f32.mrb[5].mxu0 }
 0x14a   : > { %v970_v11 = vmul.f32 0.0078125, %v947_v10 }
 0x14b   : > { %1001 = vperm.xlu1 %2750, %v971_v9  }
 0x14c   : > { %996 = vperm.xlu0 %2749, %v970_v11  }
 0x155   : > { %v2549_v12 = vpop.f32.mrb[6].mxu0 }
 0x156   : > { %v973_v13 = vmul.f32 0.0078125, %v2549_v12  ;;  %v957_v15 = vpop.f32.mrb[7].mxu0  ;;  %v2774_v12 = vld [vmem:[%s3953_s5 + $0x90] ss:$12 sps:$4 sm:$0xff]  }
 0x157   : > { %v972_v16 = vmul.f32 0.0078125, %v957_v15  ;;  %v2777_v15 = vld [vmem:[%s3953_s5 + $0x80] ss:$12 sps:$4 sm:$0xff]  }
 0x158   : > { %1011 = vperm.xlu1 %2750, %v973_v13   ;;  %v2776_v13 = vld [vmem:[%s3953_s5 + $0x94] ss:$12 sps:$4 sm:$0xff]  }
 0x159   : > { %1006 = vperm.xlu0 %2749, %v972_v16   ;;  %1430 = vmatprep.subr.bf16.mxu0 %v2776_v13 }
 0x15a   : > { %1431 = vmatpush1.bf16.msra.mxu0 %v2774_v12 }
 0x1b1   : > { %v977_v17 = vpop.permute.xlu0 %976 }
 0x1b2   : > { %v3384_v6 = vsub.f32 %v3243_v50, %v977_v17 }
 0x1b4   : > { %v1022_v18 = vmul.f32 %v3384_v6, %v3384_v6 }
 0x1b5   : > { %v982_v1 = vpop.permute.xlu0 %981 }
 0x1b6   : > { %v3389_v24 = vsub.f32 %v3274_v14, %v982_v1  ;;  %2582 = vmatprep.mubr.f32.mxu1 %v1022_v18 }
 0x1b8   : > { %v1023_v5 = vmul.f32 %v3389_v24, %v3389_v24 }
 0x1ba   : > { %2583 = vmatmul.mubr.f32.vlgmr.msra.gmra.mrb[0].mxu1 %v1023_v5 }
 0x1bb   : > { %2595 = vmatpush3.bf16.msra.mxu1 %v2757_v35 }
 0x1bc   : > { %2596 = vmatprep.subr.bf16.mxu1 %v2761_v36 }
 0x1bf   : > { %v987_v25 = vpop.permute.xlu1 %986  ;;  %2597 = vmatpush3.bf16.msra.mxu1 %v2761_v36 }
 0x1c0   : > { %v3394_v27 = vsub.f32 %v3297_v56, %v987_v25  ;;  %2598 = vmatprep.subr.bf16.mxu1 %v2765_v49 }
 0x1c2   : > { %v1024_v50 = vmul.f32 %v3394_v27, %v3394_v27 }
 0x1c3   : > { %v992_v29 = vpop.permute.xlu1 %991  ;;  %2599 = vmatpush3.bf16.msra.mxu1 %v2765_v49 }
 0x1c4   : > { %v3399_v30 = vsub.f32 %v3325_v26, %v992_v29  ;;  %2585 = vmatprep.mubr.f32.mxu1 %v1024_v50 }
 0x1c6   : > { %v1025_v14 = vmul.f32 %v3399_v30, %v3399_v30 }
 0x1c8   : > { %2586 = vmatmul.mubr.f32.gmra.mrb[2].mxu1 %v1025_v14 }
 0x1ca   : > { %v1002_v28 = vpop.permute.xlu1 %1001 }
 0x1cb   : > { %v997_v39 = vpop.permute.xlu0 %996  ;;  %v3404_v41 = vsub.f32 %v3365_v40, %v1002_v28  ;;  %v2778_v28 = vld [vmem:[%s3953_s5 + $0xa8] ss:$12 sps:$4 sm:$0xff]  }
 0x1cc   : > { %v3407_v56 = vsub.f32 %v3348_v2, %v997_v39  ;;  %v2780_v39 = vld [vmem:[%s3953_s5 + $0xac] ss:$12 sps:$4 sm:$0xff]  }
 0x1cd   : > { %v1027_v45 = vmul.f32 %v3404_v41, %v3404_v41  ;;  %1432 = vmatprep.subr.bf16.mxu0 %v2780_v39  ;;  %v2792_v39 = vld [vmem:[%s3955_s7 + $0x18] sm:$0xff]  }
 0x1ce   : > { %v1026_v26 = vmul.f32 %v3407_v56, %v3407_v56  ;;  %1433 = vmatpush1.bf16.msra.mxu0 %v2778_v28  ;;  %v2793_v28 = vld [vmem:[%s3955_s7 + $0x90] sm:$0xff]  }
 0x1d0   : > { %2588 = vmatprep.mubr.f32.mxu1 %v1026_v26 }
 0x1d1   : > { %2589 = vmatmul.mubr.f32.gmra.mrb[4].mxu1 %v1027_v45 }
 0x1d7   : > { %v1012_v46 = vpop.permute.xlu1 %1011 }
 0x1d8   : > { %v1007_v31 = vpop.permute.xlu0 %1006  ;;  %v3413_v43 = vsub.f32 %v860_v58, %v1012_v46  ;;  %v2781_v46 = vld [vmem:[%s3953_s5 + $0x98] ss:$12 sps:$4 sm:$0xff]  }
 0x1d9   : > { %v3416_v47 = vsub.f32 %v3374_v53, %v1007_v31  ;;  %v2769_v53 = vld [vmem:[%s3953_s5 + $0x50] ss:$12 sps:$4 sm:$0xff]  }
 0x1da   : > { %v1029_v40 = vmul.f32 %v3413_v43, %v3413_v43  ;;  %2600 = vmatprep.subr.bf16.mxu1 %v2769_v53 }
 0x1db   : > { %v1028_v2 = vmul.f32 %v3416_v47, %v3416_v47  ;;  %2601 = vmatpush3.bf16.msra.mxu1 %v2769_v53 }
 0x1dc   : > { %2602 = vmatprep.subr.bf16.mxu1 %v2773_v19 }
 0x1dd   : > { %2591 = vmatprep.mubr.f32.mxu1 %v1028_v2 }
 0x1de   : > { %2592 = vmatmul.mubr.f32.gmra.mrb[6].mxu1 %v1029_v40 }
 0x1df   : > { %2603 = vmatpush3.bf16.msra.mxu1 %v2773_v19 }
 0x1e0   : > { %2604 = vmatprep.subr.bf16.mxu1 %v2777_v15 }
 0x1e3   : > { %2605 = vmatpush3.bf16.msra.mxu1 %v2777_v15 }
 0x1e4   : > { %2606 = vmatprep.subr.bf16.mxu1 %v2781_v46 }
 0x1e7   : > { %2607 = vmatpush3.bf16.msra.mxu1 %v2781_v46  ;;  %v2795_v46 = vld [vmem:[%s3955_s7 + $0x20] sm:$0xff]  }
 0x1e8   : > { %2608 = vmatprep.subr.bf16.mxu1 %v2782_v34 }
 0x1eb   : > { %2609 = vmatpush3.bf16.msra.mxu1 %v2782_v34  ;;  %v2801_v34 = vld [vmem:[%s3955_s7 + $0x30] sm:$0xff]  }
 0x28d   : > { %v2584_v54 = vpop.f32.mrb[0].mxu1 }
 0x28e   : > { %v1136_v58 = vmul.f32 0.0078125, %v2584_v54  ;;  %v1096_v60 = vpop.f32.mrb[1].mxu1 }
 0x28f   : > { %v1135_v61 = vmul.f32 0.0078125, %v1096_v60 }
 0x290   : > { %v1144_v63 = vadd.f32 1e-06, %v1136_v58 }
 0x291   : > { %v1143_v62 = vadd.f32 1e-06, %v1135_v61 }
 0x292   : > { %2807 = vrsqrt.f32 %v1144_v63 }
 0x293   : > { %2809 = vrsqrt.f32 %v1143_v62 }
 0x29b   : > { %v2587_v0 = vpop.f32.mrb[2].mxu1 }
 0x29c   : > { %v2808_v3 = vpop.eup %2807  ;;  %v1138_v4 = vmul.f32 0.0078125, %v2587_v0  ;;  %v1106_v7 = vpop.f32.mrb[3].mxu1 }
 0x29d   : > { %v2810_v8 = vpop.eup %2809  ;;  %v1137_v9 = vmul.f32 0.0078125, %v1106_v7  ;;  %1166 = vperm.xlu1 %2750, %v2808_v3  }
 0x29e   : > { %v1146_v10 = vadd.f32 1e-06, %v1138_v4  ;;  %1161 = vperm.xlu0 %2749, %v2810_v8  }
 0x29f   : > { %v1145_v11 = vadd.f32 1e-06, %v1137_v9 }
 0x2a0   : > { %2811 = vrsqrt.f32 %v1146_v10 }
 0x2a1   : > { %2813 = vrsqrt.f32 %v1145_v11 }
 0x2a4   : > { %v2590_v16 = vpop.f32.mrb[4].mxu1 }
 0x2a5   : > { %v1140_v17 = vmul.f32 0.0078125, %v2590_v16  ;;  %v1116_v18 = vpop.f32.mrb[5].mxu1 }
 0x2a6   : > { %v1139_v1 = vmul.f32 0.0078125, %v1116_v18 }
 0x2a7   : > { %v1148_v5 = vadd.f32 1e-06, %v1140_v17 }
 0x2a8   : > { %v1147_v25 = vadd.f32 1e-06, %v1139_v1  ;;  %v2783_v1 = vld [vmem:[%s3955_s7 + $0x40] sm:$0xff]  }
 0x2a9   : > { %2815 = vrsqrt.f32 %v1148_v5  ;;  %2454 = vmatprep.subr.bf16.mxu0 %v2783_v1  ;;  %v2786_v5 = vld [vmem:[%s3955_s7 + $0x8] sm:$0xff]  }
 0x2aa   : > { %v2812_v50 = vpop.eup %2811  ;;  %2817 = vrsqrt.f32 %v1147_v25  ;;  %v2788_v25 = vld [vmem:[%s3955_s7 + $0x50] sm:$0xff]  }
 0x2ab   : > { %v2814_v29 = vpop.eup %2813  ;;  %1176 = vperm.xlu1 %2750, %v2812_v50   ;;  %v2790_v50 = vld [vmem:[%s3955_s7 + $0x88] sm:$0xff]  }
 0x2ac   : > { %1171 = vperm.xlu0 %2749, %v2814_v29   ;;  %v2789_v29 = vld [vmem:[%s3955_s7 + $0x10] sm:$0xff]  }
 0x2b1   : > { %v2593_v14 = vpop.f32.mrb[6].mxu1 }
 0x2b2   : > { %v1142_v45 = vmul.f32 0.0078125, %v2593_v14  ;;  %v1126_v26 = vpop.f32.mrb[7].mxu1  ;;  %v2791_v14 = vld [vmem:[%s3955_s7 + $0x58] sm:$0xff]  }
 0x2b3   : > { %v2816_v31 = vpop.eup %2815  ;;  %v1141_v40 = vmul.f32 0.0078125, %v1126_v26  ;;  %v2796_v26 = vld [vmem:[%s3955_s7 + $0x98] sm:$0xff]  }
 0x2b4   : > { %v2818_v2 = vpop.eup %2817  ;;  %v1150_v32 = vadd.f32 1e-06, %v1142_v45  ;;  %1186 = vperm.xlu1 %2750, %v2816_v31   ;;  %v2794_v45 = vld [vmem:[%s3955_s7 + $0x60] sm:$0xff]   ;;  %v2797_v31 = vld [vmem:[%s3955_s7 + $0x68] sm:$0xff]  }
 0x2b5   : > { %v1149_v33 = vadd.f32 1e-06, %v1141_v40  ;;  %1181 = vperm.xlu0 %2749, %v2818_v2   ;;  %v2799_v40 = vld [vmem:[%s3955_s7 + $0xa0] sm:$0xff]   ;;  %v2798_v2 = vld [vmem:[%s3955_s7 + $0x28] sm:$0xff]  }
 0x2b6   : > { %2819 = vrsqrt.f32 %v1150_v32  ;;  %v2800_v32 = vld [vmem:[%s3955_s7 + $0x70] sm:$0xff]  }
 0x2b7   : > { %2821 = vrsqrt.f32 %v1149_v33  ;;  %v2802_v33 = vld [vmem:[%s3955_s7 + $0xa8] sm:$0xff]  }
 0x2c0   : > { %v2820_v35 = vpop.eup %2819 }
 0x2c1   : > { %v2822_v36 = vpop.eup %2821  ;;  %1196 = vperm.xlu1 %2750, %v2820_v35   ;;  %v2803_v35 = vld [vmem:[%s3955_s7 + $0x78] sm:$0xff]  }
 0x2c2   : > { %1191 = vperm.xlu0 %2749, %v2822_v36   ;;  %v2805_v36 = vld [vmem:[%s3955_s7 + $0xb0] sm:$0xff]  }
 0x31c   : > { %v1167_v48 = vpop.permute.xlu1 %1166 }
 0x31d   : > { %v1200_v49 = vmul.f32 %v1167_v48, %v3389_v24  ;;  %v1162_v52 = vpop.permute.xlu0 %1161  ;;  %v2806_v48 = vld [vmem:[%s3955_s7 + $0xb8] sm:$0xff]  }
 0x31e   : > { %v1199_v53 = vmul.f32 %v1162_v52, %v3384_v6 }
 0x31f   : > { %v1215_v51 = vmul.f32 %v2331_v37, %v1200_v49  ;;  %v1273_v49 = vld [vmem:[%s3954_s6] sm:$0x7] }
 0x320   : > { %v1214_v55 = vmul.f32 %v2331_v37, %v1199_v53  ;;  %v3588_v52 = vrot.slane %v1273_v49, %v501_v21 }
 0x321   : > { %v1230_v19 = vadd.f32 %v2332_v42, %v1215_v51 }
 0x322   : > { %v1229_v44 = vadd.f32 %v2332_v42, %v1214_v55 }
 0x324   : > { %v1237_v57 = vpack.c.bf16 %v1230_v19, %v1229_v44 }
 0x326   : > { %1451 = vmatmul.mubr.bf16.vlgmr.msra.gmra.mrb[8].mxu0 %v1237_v57  ;;  %2610 = vmatprep.mubr.bf16.mxu1 %v1237_v57 }
 0x327   : > { %1460 = vmatprep.mubr.bf16.mxu0 %v2979_v59 }
 0x32a   : > { %v1177_v38 = vpop.permute.xlu1 %1176 }
 0x32b   : > { %v1202_v54 = vmul.f32 %v1177_v38, %v3399_v30  ;;  %v1172_v24 = vpop.permute.xlu0 %1171 }
 0x32c   : > { %v1201_v58 = vmul.f32 %v1172_v24, %v3394_v27 }
 0x32d   : > { %v1217_v60 = vmul.f32 %v2331_v37, %v1202_v54 }
 0x32e   : > { %v1216_v61 = vmul.f32 %v2331_v37, %v1201_v58 }
 0x32f   : > { %v1232_v63 = vadd.f32 %v2332_v42, %v1217_v60 }
 0x330   : > { %v1231_v62 = vadd.f32 %v2332_v42, %v1216_v61 }
 0x332   : > { %v1238_v6 = vpack.c.bf16 %v1232_v63, %v1231_v62 }
 0x333   : > { %v1187_v0 = vpop.permute.xlu1 %1186 }
 0x334   : > { %2611 = vmatmul.mubr.bf16.vlgmr.msra.gmra.mrb[8].mxu1 %v1238_v6  ;;  %1461 = vmatmul.mubr.bf16.gmra.mrb[12].mxu0 %v1238_v6  ;;  %v1204_v3 = vmul.f32 %v1187_v0, %v3404_v41  ;;  %v1182_v4 = vpop.permute.xlu0 %1181 }
 0x335   : > { %1470 = vmatprep.mubr.bf16.mxu0 %v2979_v59  ;;  %v1203_v7 = vmul.f32 %v1182_v4, %v3407_v56 }
 0x336   : > { %v1219_v8 = vmul.f32 %v2331_v37, %v1204_v3 }
 0x337   : > { %v1218_v30 = vmul.f32 %v2331_v37, %v1203_v7 }
 0x338   : > { %v1234_v9 = vadd.f32 %v2332_v42, %v1219_v8 }
 0x339   : > { %v1233_v10 = vadd.f32 %v2332_v42, %v1218_v30 }
 0x33b   : > { %v1239_v27 = vpack.c.bf16 %v1234_v9, %v1233_v10  ;;  %v3623_v10 = vrot.slane %v1273_v49, %v583_v23 }
 0x33d   : > { %2614 = vmatprep.mubr.bf16.mxu1 %v1239_v27  ;;  %1471 = vmatmul.mubr.bf16.gmra.mrb[16].mxu0 %v1239_v27 }
 0x33e   : > { %1480 = vmatprep.mubr.bf16.mxu0 %v2979_v59  ;;  %v2784_v59 = vld [vmem:[%s3955_s7] sm:$0xff]  }
 0x33f   : > { %2455 = vmatpush3.bf16.msra.mxu0 %v2784_v59 }
 0x340   : > { %v1197_v11 = vpop.permute.xlu1 %1196 }
 0x341   : > { %v1206_v12 = vmul.f32 %v1197_v11, %v3413_v43  ;;  %v1192_v13 = vpop.permute.xlu0 %1191  ;;  %v2785_v43 = vld [vmem:[%s3955_s7 + $0x48] sm:$0xff]  }
 0x342   : > { %v1205_v41 = vmul.f32 %v1192_v13, %v3416_v47  ;;  %v2787_v47 = vld [vmem:[%s3955_s7 + $0x80] sm:$0xff]   ;;  %2456 = vmatprep.subr.bf16.mxu0 %v2785_v43 }
 0x343   : > { %v1221_v15 = vmul.f32 %v2331_v37, %v1206_v12  ;;  %2618 = vmatprep.subr.bf16.mxu1 %v2787_v47  ;;  %2457 = vmatpush3.bf16.msra.mxu0 %v2786_v5 }
 0x344   : > { %v1220_v16 = vmul.f32 %v2331_v37, %v1205_v41  ;;  %2619 = vmatpush3.bf16.msra.mxu1 %v2787_v47  ;;  %2458 = vmatprep.subr.bf16.mxu0 %v2788_v25  ;;  %v2804_v37 = vld [vmem:[%s3955_s7 + $0x38] sm:$0xff]  }
 0x345   : > { %v1236_v17 = vadd.f32 %v2332_v42, %v1221_v15  ;;  %2620 = vmatprep.subr.bf16.mxu1 %v2790_v50 }
 0x346   : > { %v1235_v18 = vadd.f32 %v2332_v42, %v1220_v16  ;;  %v3592_v42 = vrot.slane %v1273_v49, %v527_v22 }
 0x347   : > { %2459 = vmatpush3.bf16.msra.mxu0 %v2789_v29 }
 0x348   : > { %v1240_v56 = vpack.c.bf16 %v1236_v17, %v1235_v18  ;;  %2621 = vmatpush3.bf16.msra.mxu1 %v2790_v50  ;;  %2460 = vmatprep.subr.bf16.mxu0 %v2791_v14 }
 0x349   : > { %2622 = vmatprep.subr.bf16.mxu1 %v2793_v28 }
 0x34a   : > { %2615 = vmatmul.mubr.bf16.gmra.mrb[12].mxu1 %v1240_v56  ;;  %1481 = vmatmul.mubr.bf16.gmra.mrb[20].mxu0 %v1240_v56 }
 0x34b   : > { %2461 = vmatpush3.bf16.msra.mxu0 %v2792_v39 }
 0x34c   : > { %2623 = vmatpush3.bf16.msra.mxu1 %v2793_v28  ;;  %2462 = vmatprep.subr.bf16.mxu0 %v2794_v45 }
 0x34d   : > { %2624 = vmatprep.subr.bf16.mxu1 %v2796_v26 }
 0x34f   : > { %2463 = vmatpush3.bf16.msra.mxu0 %v2795_v46 }
 0x350   : > { %2625 = vmatpush3.bf16.msra.mxu1 %v2796_v26  ;;  %2464 = vmatprep.subr.bf16.mxu0 %v2797_v31 }
 0x351   : > { %2626 = vmatprep.subr.bf16.mxu1 %v2799_v40 }
 0x353   : > { %2465 = vmatpush3.bf16.msra.mxu0 %v2798_v2 }
 0x354   : > { %2627 = vmatpush3.bf16.msra.mxu1 %v2799_v40  ;;  %2466 = vmatprep.subr.bf16.mxu0 %v2800_v32 }
 0x355   : > { %2628 = vmatprep.subr.bf16.mxu1 %v2802_v33 }
 0x357   : > { %2467 = vmatpush3.bf16.msra.mxu0 %v2801_v34 }
 0x358   : > { %2629 = vmatpush3.bf16.msra.mxu1 %v2802_v33  ;;  %2468 = vmatprep.subr.bf16.mxu0 %v2803_v35 }
 0x359   : > { %2630 = vmatprep.subr.bf16.mxu1 %v2805_v36 }
 0x35b   : > { %2469 = vmatpush3.bf16.msra.mxu0 %v2804_v37 }
 0x35c   : > { %2631 = vmatpush3.bf16.msra.mxu1 %v2805_v36 }
 0x35d   : > { %2632 = vmatprep.subr.bf16.mxu1 %v2806_v48 }
 0x360   : > { %2633 = vmatpush3.bf16.msra.mxu1 %v2806_v48 }
 0x3f9   : > { %v1452_v53 = vpop.f32.mrb[8].mxu0 }
 0x3fa   : > { %v3595_v51 = vadd.f32 %v1452_v53, %v3588_v52  ;;  %v1454_v55 = vpop.f32.mrb[9].mxu0 }
 0x3fb   : > { %v3598_v19 = vadd.f32 %v1454_v55, %v3592_v42  ;;  %v1456_v44 = vpop.f32.mrb[10].mxu0 }
 0x3fc   : > { %v1556_v57 = vmul.f32 %v3595_v51, %v3595_v51  ;;  %v3603_v38 = vadd.f32 %v1456_v44, %v3588_v52  ;;  %v1458_v21 = vpop.f32.mrb[11].mxu0 }
 0x3fd   : > { %v1557_v22 = vmul.f32 %v3598_v19, %v3598_v19  ;;  %v3608_v54 = vadd.f32 %v1458_v21, %v3592_v42 }
 0x3fe   : > { %v1580_v24 = vmul.f32 %v1556_v57, %v3595_v51  ;;  %v1559_v58 = vmul.f32 %v3603_v38, %v3603_v38 }
 0x3ff   : > { %v1581_v60 = vmul.f32 %v1557_v22, %v3598_v19  ;;  %v1560_v61 = vmul.f32 %v3608_v54, %v3608_v54 }
 0x400   : > { %v1604_v63 = vmul.f32 0.044715, %v1580_v24  ;;  %v1583_v62 = vmul.f32 %v1559_v58, %v3603_v38 }
 0x401   : > { %v1605_v6 = vmul.f32 0.044715, %v1581_v60  ;;  %v1584_v0 = vmul.f32 %v1560_v61, %v3608_v54 }
 0x402   : > { %v1628_v3 = vadd.f32 %v1604_v63, %v3595_v51  ;;  %v1607_v4 = vmul.f32 0.044715, %v1583_v62 }
 0x403   : > { %v1629_v7 = vadd.f32 %v1605_v6, %v3598_v19  ;;  %v1608_v8 = vmul.f32 0.044715, %v1584_v0 }
 0x404   : > { %v1652_v30 = vmul.f32 0.7978846, %v1628_v3  ;;  %v1631_v9 = vadd.f32 %v1607_v4, %v3603_v38 }
 0x405   : > { %v1653_v27 = vmul.f32 0.7978846, %v1629_v7  ;;  %v1632_v11 = vadd.f32 %v1608_v8, %v3608_v54 }
 0x406   : > { %2823 = vtanh.f32 %v1652_v30  ;;  %v1655_v12 = vmul.f32 0.7978846, %v1631_v9 }
 0x407   : > { %2825 = vtanh.f32 %v1653_v27  ;;  %v1656_v13 = vmul.f32 0.7978846, %v1632_v11  ;;  %v2612_v41 = vpop.f32.mrb[8].mxu1  ;;  %v1462_v15 = vpop.f32.mrb[12].mxu0 }
 0x408   : > { %2827 = vtanh.f32 %v1655_v12  ;;  %v3627_v16 = vadd.f32 %v2612_v41, %v3623_v10  ;;  %v1525_v17 = vpop.f32.mrb[9].mxu1  ;;  %v3630_v18 = vadd.f32 %v1462_v15, %v3588_v52  ;;  %v1464_v20 = vpop.f32.mrb[13].mxu0 }
 0x409   : > { %2829 = vtanh.f32 %v1656_v13  ;;  %v3633_v23 = vadd.f32 %v1525_v17, %v3623_v10  ;;  %v2613_v56 = vpop.f32.mrb[10].mxu1  ;;  %v3636_v1 = vadd.f32 %v1464_v20, %v3592_v42  ;;  %v1466_v59 = vpop.f32.mrb[14].mxu0 }
 0x40a   : > { %v1564_v43 = vmul.f32 %v3627_v16, %v3627_v16  ;;  %v3641_v47 = vadd.f32 %v2613_v56, %v3623_v10  ;;  %v1528_v5 = vpop.f32.mrb[11].mxu1  ;;  %v1562_v25 = vmul.f32 %v3630_v18, %v3630_v18  ;;  %v3646_v50 = vadd.f32 %v1466_v59, %v3588_v52  ;;  %v1468_v29 = vpop.f32.mrb[15].mxu0 }
 0x40b   : > { %v1558_v14 = vmul.f32 %v3633_v23, %v3633_v23  ;;  %v3651_v28 = vadd.f32 %v1528_v5, %v3623_v10  ;;  %v1563_v39 = vmul.f32 %v3636_v1, %v3636_v1  ;;  %v3656_v45 = vadd.f32 %v1468_v29, %v3592_v42 }
 0x40c   : > { %v1588_v26 = vmul.f32 %v1564_v43, %v3627_v16  ;;  %v1567_v46 = vmul.f32 %v3641_v47, %v3641_v47  ;;  %v1586_v31 = vmul.f32 %v1562_v25, %v3630_v18  ;;  %v1565_v40 = vmul.f32 %v3646_v50, %v3646_v50 }
 0x40d   : > { %v1582_v2 = vmul.f32 %v1558_v14, %v3633_v23  ;;  %v1561_v32 = vmul.f32 %v3651_v28, %v3651_v28  ;;  %v1587_v33 = vmul.f32 %v1563_v39, %v3636_v1  ;;  %v1566_v34 = vmul.f32 %v3656_v45, %v3656_v45 }
 0x40e   : > { %v1612_v35 = vmul.f32 0.044715, %v1588_v26  ;;  %v1591_v36 = vmul.f32 %v1567_v46, %v3641_v47  ;;  %v1610_v37 = vmul.f32 0.044715, %v1586_v31  ;;  %v1589_v48 = vmul.f32 %v1565_v40, %v3646_v50 }
 0x40f   : > { %v1606_v49 = vmul.f32 0.044715, %v1582_v2  ;;  %v1585_v53 = vmul.f32 %v1561_v32, %v3651_v28  ;;  %v1611_v55 = vmul.f32 0.044715, %v1587_v33  ;;  %v1590_v8 = vmul.f32 %v1566_v34, %v3656_v45 }
 0x410   : > { %v2824_v44 = vpop.eup %2823  ;;  %v1636_v57 = vadd.f32 %v1612_v35, %v3627_v16  ;;  %v1615_v21 = vmul.f32 0.044715, %v1591_v36  ;;  %v1634_v22 = vadd.f32 %v1610_v37, %v3630_v18  ;;  %v1613_v24 = vmul.f32 0.044715, %v1589_v48  ;;  %v1472_v6 = vpop.f32.mrb[16].mxu0 }
 0x411   : > { %v2826_v58 = vpop.eup %2825  ;;  %v1700_v60 = vadd.f32 1.0, %v2824_v44  ;;  %v1630_v61 = vadd.f32 %v1606_v49, %v3633_v23  ;;  %v1609_v63 = vmul.f32 0.044715, %v1585_v53  ;;  %v1635_v62 = vadd.f32 %v1611_v55, %v3636_v1  ;;  %v1474_v30 = vpop.f32.mrb[17].mxu0 }
 0x412   : > { %v2828_v0 = vpop.eup %2827  ;;  %v1660_v3 = vmul.f32 0.7978846, %v1636_v57  ;;  %v1639_v4 = vadd.f32 %v1615_v21, %v3641_v47  ;;  %v1637_v7 = vadd.f32 %v1613_v24, %v3646_v50  ;;  %v1476_v41 = vpop.f32.mrb[18].mxu0  ;;  %v1658_v17 = vmul.f32 0.7978846, %v1634_v22 }
 0x413   : > { %v2830_v9 = vpop.eup %2829  ;;  %v1724_v27 = vmul.f32 0.5, %v1700_v60  ;;  %v1703_v11 = vadd.f32 1.0, %v2828_v0  ;;  %v1654_v12 = vmul.f32 0.7978846, %v1630_v61  ;;  %v1633_v13 = vadd.f32 %v1609_v63, %v3651_v28  ;;  %v1478_v25 = vpop.f32.mrb[19].mxu0 }
 0x414   : > { %2831 = vtanh.f32 %v1660_v3  ;;  %v1663_v15 = vmul.f32 0.7978846, %v1639_v4  ;;  %v1659_v20 = vmul.f32 0.7978846, %v1635_v62  ;;  %v1661_v5 = vmul.f32 0.7978846, %v1637_v7 }
 0x415   : > { %v3682_v56 = vmul.f32 %v1724_v27, %v3595_v51  ;;  %v1727_v59 = vmul.f32 0.5, %v1703_v11  ;;  %v1657_v43 = vmul.f32 0.7978846, %v1633_v13  ;;  %v1614_v29 = vmul.f32 0.044715, %v1590_v8 }
 0x416   : > { %2833 = vtanh.f32 %v1663_v15  ;;  %v3685_v14 = vadd.f32 %v1472_v6, %v3588_v52  ;;  %v3688_v39 = vadd.f32 %v1474_v30, %v3592_v42  ;;  %v3694_v46 = vadd.f32 %v1476_v41, %v3588_v52 }
 0x417   : > { %v3691_v26 = vmul.f32 %v1727_v59, %v3603_v38  ;;  %2835 = vtanh.f32 %v1654_v12  ;;  %v3697_v51 = vadd.f32 %v1478_v25, %v3592_v42  ;;  %v1638_v31 = vadd.f32 %v1614_v29, %v3656_v45 }
 0x418   : > { %2837 = vtanh.f32 %v1657_v43  ;;  %v1568_v40 = vmul.f32 %v3685_v14, %v3685_v14  ;;  %v1569_v2 = vmul.f32 %v3688_v39, %v3688_v39  ;;  %v1571_v32 = vmul.f32 %v3694_v46, %v3694_v46 }
 0x419   : > { %v1772_v38 = vpack.c.bf16 %v3691_v26, %v3682_v56  ;;  %2839 = vtanh.f32 %v1658_v17  ;;  %v1572_v33 = vmul.f32 %v3697_v51, %v3697_v51  ;;  %v1662_v34 = vmul.f32 0.7978846, %v1638_v31 }
 0x41a   : > { %2841 = vtanh.f32 %v1659_v20  ;;  %v1592_v35 = vmul.f32 %v1568_v40, %v3685_v14  ;;  %v1593_v36 = vmul.f32 %v1569_v2, %v3688_v39  ;;  %v1595_v37 = vmul.f32 %v1571_v32, %v3694_v46 }
 0x41b   : > { %v1596_v48 = vmul.f32 %v1572_v33, %v3697_v51  ;;  %v1701_v49 = vadd.f32 1.0, %v2826_v58  ;;  %v1704_v53 = vadd.f32 1.0, %v2830_v9  ;;  %2843 = vtanh.f32 %v1661_v5 }
 0x41c   : > { %v1616_v55 = vmul.f32 0.044715, %v1592_v35  ;;  %v1617_v44 = vmul.f32 0.044715, %v1593_v36  ;;  %2845 = vtanh.f32 %v1662_v34  ;;  %v1619_v57 = vmul.f32 0.044715, %v1595_v37 }
 0x41d   : > { %v1620_v21 = vmul.f32 0.044715, %v1596_v48  ;;  %v2616_v24 = vpop.f32.mrb[12].mxu1  ;;  %v1482_v63 = vpop.f32.mrb[20].mxu0  ;;  %v3716_v62 = vmul.f32 0.5, %v1701_v49  ;;  %v3718_v6 = vmul.f32 0.5, %v1704_v53 }
 0x41e   : > { %v2832_v22 = vpop.eup %2831  ;;  %v1640_v60 = vadd.f32 %v1616_v55, %v3685_v14  ;;  %v1641_v61 = vadd.f32 %v1617_v44, %v3688_v39  ;;  %v3721_v58 = vadd.f32 %v2616_v24, %v3623_v10  ;;  %v1541_v3 = vpop.f32.mrb[13].mxu1  ;;  %v1643_v4 = vadd.f32 %v1619_v57, %v3694_v46 }
 0x41f   : > { %v1708_v0 = vadd.f32 1.0, %v2832_v22  ;;  %v1644_v7 = vadd.f32 %v1620_v21, %v3697_v51  ;;  %v1484_v8 = vpop.f32.mrb[21].mxu0  ;;  %v3726_v9 = vadd.f32 %v1541_v3, %v3623_v10  ;;  %v2617_v27 = vpop.f32.mrb[14].mxu1  ;;  %v3729_v13 = vadd.f32 %v1482_v63, %v3588_v52 }
 0x420   : > { %v2834_v30 = vpop.eup %2833  ;;  %v1664_v11 = vmul.f32 0.7978846, %v1640_v60  ;;  %v1665_v12 = vmul.f32 0.7978846, %v1641_v61  ;;  %v1486_v41 = vpop.f32.mrb[22].mxu0  ;;  %v1576_v59 = vmul.f32 %v3721_v58, %v3721_v58  ;;  %v3736_v43 = vadd.f32 %v2617_v27, %v3623_v10 }
 0x421   : > { %v3731_v15 = vpop.eup %2835  ;;  %v1732_v17 = vmul.f32 0.5, %v1708_v0  ;;  %v1711_v20 = vadd.f32 1.0, %v2834_v30  ;;  %v1544_v5 = vpop.f32.mrb[15].mxu1  ;;  %v1570_v31 = vmul.f32 %v3726_v9, %v3726_v9  ;;  %v1667_v2 = vmul.f32 0.7978846, %v1643_v4 }
 0x422   : > { %v1488_v25 = vpop.f32.mrb[23].mxu0  ;;  %v2838_v29 = vpop.eup %2837  ;;  %v3741_v40 = vadd.f32 %v1544_v5, %v3623_v10  ;;  %2847 = vtanh.f32 %v1664_v11  ;;  %v1600_v35 = vmul.f32 %v1576_v59, %v3721_v58  ;;  %v1579_v36 = vmul.f32 %v3736_v43, %v3736_v43 }
 0x423   : > { %v3743_v32 = vpop.eup %2839  ;;  %v3746_v33 = vmul.f32 %v1732_v17, %v3627_v16  ;;  %v1735_v34 = vmul.f32 0.5, %v1711_v20  ;;  %v1594_v48 = vmul.f32 %v1570_v31, %v3726_v9  ;;  %2849 = vtanh.f32 %v1665_v12 }
 0x424   : > { %v2842_v37 = vpop.eup %2841  ;;  %v1573_v10 = vmul.f32 %v3741_v40, %v3741_v40  ;;  %v1668_v49 = vmul.f32 0.7978846, %v1644_v7  ;;  %v1624_v55 = vmul.f32 0.044715, %v1600_v35  ;;  %v1603_v16 = vmul.f32 %v1579_v36, %v3736_v43 }
 0x425   : > { %v3755_v53 = vmul.f32 %v1735_v34, %v3641_v47  ;;  %2851 = vtanh.f32 %v1667_v2  ;;  %v3758_v44 = vpop.eup %2843  ;;  %v1618_v57 = vmul.f32 0.044715, %v1594_v48  ;;  %v1574_v22 = vmul.f32 %v3729_v13, %v3729_v13 }
 0x426   : > { %v1597_v21 = vmul.f32 %v1573_v10, %v3741_v40  ;;  %2853 = vtanh.f32 %v1668_v49  ;;  %v2846_v24 = vpop.eup %2845  ;;  %v1648_v47 = vadd.f32 %v1624_v55, %v3721_v58  ;;  %v1627_v61 = vmul.f32 0.044715, %v1603_v16 }
 0x427   : > { %v1777_v60 = vpack.c.bf16 %v3755_v53, %v3746_v33  ;;  %v3767_v63 = vadd.f32 %v1484_v8, %v3592_v42  ;;  %v1642_v0 = vadd.f32 %v1618_v57, %v3726_v9  ;;  %v1598_v4 = vmul.f32 %v1574_v22, %v3729_v13 }
 0x428   : > { %v1621_v3 = vmul.f32 0.044715, %v1597_v21  ;;  %v3772_v7 = vadd.f32 %v1486_v41, %v3588_v52  ;;  %v1672_v30 = vmul.f32 0.7978846, %v1648_v47  ;;  %v1651_v27 = vadd.f32 %v1627_v61, %v3736_v43 }
 0x429   : > { %v1575_v11 = vmul.f32 %v3767_v63, %v3767_v63  ;;  %v3778_v12 = vadd.f32 %v1488_v25, %v3592_v42  ;;  %v1666_v17 = vmul.f32 0.7978846, %v1642_v0  ;;  %v1622_v20 = vmul.f32 0.044715, %v1598_v4 }
 0x42a   : > { %v1645_v8 = vadd.f32 %v1621_v3, %v3741_v40  ;;  %v1577_v59 = vmul.f32 %v3772_v7, %v3772_v7  ;;  %2855 = vtanh.f32 %v1672_v30  ;;  %v1675_v5 = vmul.f32 0.7978846, %v1651_v27 }
 0x42b   : > { %v1599_v52 = vmul.f32 %v1575_v11, %v3767_v63  ;;  %v1578_v41 = vmul.f32 %v3778_v12, %v3778_v12  ;;  %2857 = vtanh.f32 %v1666_v17  ;;  %v1646_v42 = vadd.f32 %v1622_v20, %v3729_v13 }
 0x42c   : > { %v2848_v31 = vpop.eup %2847  ;;  %v1669_v2 = vmul.f32 0.7978846, %v1645_v8  ;;  %v1601_v25 = vmul.f32 %v1577_v59, %v3772_v7  ;;  %2859 = vtanh.f32 %v1675_v5  ;;  %v1749_v36 = vmul.f32 %v3716_v62, %v3598_v19 }
 0x42d   : > { %v1623_v34 = vmul.f32 0.044715, %v1599_v52  ;;  %v1602_v35 = vmul.f32 %v1578_v41, %v3778_v12  ;;  %v2850_v48 = vpop.eup %2849  ;;  %v1670_v10 = vmul.f32 0.7978846, %v1646_v42  ;;  %v1752_v55 = vmul.f32 %v3718_v6, %v3608_v54 }
 0x42e   : > { %2861 = vtanh.f32 %v1669_v2  ;;  %v1625_v49 = vmul.f32 0.044715, %v1601_v25  ;;  %v1702_v22 = vadd.f32 1.0, %v3731_v15  ;;  %v1705_v47 = vadd.f32 1.0, %v2838_v29 }
 0x42f   : > { %v2852_v16 = vpop.eup %2851  ;;  %v1647_v57 = vadd.f32 %v1623_v34, %v3767_v63  ;;  %v1626_v21 = vmul.f32 0.044715, %v1602_v35  ;;  %2863 = vtanh.f32 %v1670_v10  ;;  %v1773_v3 = vpack.c.bf16 %v1752_v55, %v1749_v36 }
 0x430   : > { %v2854_v61 = vpop.eup %2853  ;;  %v1649_v0 = vadd.f32 %v1625_v49, %v3772_v7  ;;  %v1707_v19 = vadd.f32 1.0, %v2842_v37  ;;  %v1726_v30 = vmul.f32 0.5, %v1702_v22  ;;  %v1729_v27 = vmul.f32 0.5, %v1705_v47 }
 0x431   : > { %v1671_v62 = vmul.f32 0.7978846, %v1647_v57  ;;  %v1650_v4 = vadd.f32 %v1626_v21, %v3778_v12  ;;  %2015 = vmatprep.mubr.bf16.mxu0 %v1773_v3  ;;  %v1710_v54 = vadd.f32 1.0, %v2846_v24  ;;  %v1706_v17 = vadd.f32 1.0, %v3743_v32 }
 0x432   : > { %v1673_v11 = vmul.f32 0.7978846, %v1649_v0  ;;  %v1731_v6 = vmul.f32 0.5, %v1707_v19  ;;  %2016 = vmatmul.mubr.bf16.vlgmr.msra.gmra.mrb[24].mxu0 %v1772_v38  ;;  %v1750_v29 = vmul.f32 %v1726_v30, %v3633_v23  ;;  %v1753_v37 = vmul.f32 %v1729_v27, %v3651_v28 }
 0x433   : > { %2865 = vtanh.f32 %v1671_v62  ;;  %v1674_v15 = vmul.f32 0.7978846, %v1650_v4  ;;  %v1734_v8 = vmul.f32 0.5, %v1710_v54  ;;  %v1709_v59 = vadd.f32 1.0, %v3758_v44 }
 0x434   : > { %2867 = vtanh.f32 %v1673_v11  ;;  %v1755_v20 = vmul.f32 %v1731_v6, %v3636_v1  ;;  %v2856_v24 = vpop.eup %2855  ;;  %v1774_v5 = vpack.c.bf16 %v1753_v37, %v1750_v29  ;;  %v1730_v32 = vmul.f32 0.5, %v1706_v17 }
 0x435   : > { %2869 = vtanh.f32 %v1674_v15  ;;  %v1713_v52 = vadd.f32 1.0, %v2850_v48  ;;  %v2858_v41 = vpop.eup %2857  ;;  %v1758_v2 = vmul.f32 %v1734_v8, %v3656_v45  ;;  %v1733_v56 = vmul.f32 0.5, %v1709_v59 }
 0x436   : > { %v1720_v26 = vadd.f32 1.0, %v2856_v24  ;;  %v1716_v38 = vadd.f32 1.0, %v2854_v61  ;;  %v2860_v23 = vpop.eup %2859  ;;  %2634 = vmatprep.mubr.bf16.mxu1 %v1774_v5  ;;  %v1754_v28 = vmul.f32 %v1730_v32, %v3630_v18  ;;  %v1714_v42 = vadd.f32 1.0, %v2858_v41  ;;  %v3826_v24 = vld [vmem:[%s3956_s8] ss:$0 sm:$0xff] }
 0x437   : > { %v1737_v25 = vmul.f32 0.5, %v1713_v52  ;;  %v1712_v1 = vadd.f32 1.0, %v2848_v31  ;;  %2635 = vmatmul.mubr.bf16.vlgmr.msra.gmra.mrb[16].mxu1 %v1777_v60  ;;  %v1776_v44 = vpack.c.bf16 %v1758_v2, %v1755_v20  ;;  %v1757_v35 = vmul.f32 %v1733_v56, %v3646_v50  ;;  %v3832_v41 = vld [vmem:[%s3957_s9] ss:$0 sm:$0xff] }
 0x438   : > { %v2862_v34 = vpop.eup %2861  ;;  %v1723_v36 = vadd.f32 1.0, %v2860_v23  ;;  %v1744_v45 = vmul.f32 0.5, %v1720_v26  ;;  %v1738_v10 = vmul.f32 0.5, %v1714_v42  ;;  %v1740_v49 = vmul.f32 0.5, %v1716_v38 }
 0x439   : > { %v1717_v48 = vadd.f32 1.0, %v2862_v34  ;;  %v2864_v55 = vpop.eup %2863  ;;  %2023 = vmatprep.mubr.bf16.mxu0 %v1776_v44  ;;  %v1775_v57 = vpack.c.bf16 %v1757_v35, %v1754_v28  ;;  %v1715_v21 = vadd.f32 1.0, %v2852_v16  ;;  %v1761_v31 = vmul.f32 %v1737_v25, %v3688_v39 }
 0x43a   : > { %v1747_v18 = vmul.f32 0.5, %v1723_v36  ;;  %v1764_v47 = vmul.f32 %v1740_v49, %v3697_v51  ;;  %v1736_v33 = vmul.f32 0.5, %v1712_v1  ;;  %v1768_v53 = vmul.f32 %v1744_v45, %v3721_v58  ;;  %v2871_v45 = vld [vmem:[%s3133_s11] sm:$0xff] }
 0x43b   : > { %v1741_v22 = vmul.f32 0.5, %v1717_v48  ;;  %2024 = vmatmul.mubr.bf16.gmra.mrb[28].mxu0 %v1775_v57  ;;  %v1739_v60 = vmul.f32 0.5, %v1715_v21  ;;  %v1718_v61 = vadd.f32 1.0, %v2864_v55  ;;  %v1762_v3 = vmul.f32 %v1738_v10, %v3726_v9 }
 0x43c   : > { %v1771_v50 = vmul.f32 %v1747_v18, %v3736_v43  ;;  %v1779_v62 = vpack.c.bf16 %v1764_v47, %v1761_v31  ;;  %v1760_v39 = vmul.f32 %v1736_v33, %v3685_v14  ;;  %v2872_v31 = vld [vmem:[%s3133_s11 + $0x8] sm:$0xff] }
 0x43d   : > { %v2866_v0 = vpop.eup %2865  ;;  %v1765_v19 = vmul.f32 %v1741_v22, %v3741_v40  ;;  %v1763_v51 = vmul.f32 %v1739_v60, %v3694_v46  ;;  %v1742_v43 = vmul.f32 0.5, %v1718_v61 }
 0x43e   : > { %v2868_v16 = vpop.eup %2867  ;;  %v1783_v4 = vpack.c.bf16 %v1771_v50, %v1768_v53  ;;  %v1719_v30 = vadd.f32 1.0, %v2866_v0  ;;  %2031 = vmatprep.mubr.bf16.mxu0 %v1779_v62 }
 0x43f   : > { %v2870_v27 = vpop.eup %2869  ;;  %v1780_v11 = vpack.c.bf16 %v1765_v19, %v1762_v3  ;;  %v1721_v58 = vadd.f32 1.0, %v2868_v16  ;;  %v1778_v54 = vpack.c.bf16 %v1763_v51, %v1760_v39  ;;  %v1766_v15 = vmul.f32 %v1742_v43, %v3729_v13 }
 0x440   : > { %v1722_v6 = vadd.f32 1.0, %v2870_v27  ;;  %v1743_v17 = vmul.f32 0.5, %v1719_v30 }
 0x441   : > { %2638 = vmatprep.mubr.bf16.mxu1 %v1780_v11  ;;  %v1745_v9 = vmul.f32 0.5, %v1721_v58  ;;  %v2873_v58 = vld [vmem:[%s3133_s11 + $0x10] sm:$0xff] }
 0x442   : > { %2639 = vmatmul.mubr.bf16.gmra.mrb[20].mxu1 %v1783_v4  ;;  %v1746_v40 = vmul.f32 0.5, %v1722_v6  ;;  %v1767_v14 = vmul.f32 %v1743_v17, %v3767_v63 }
 0x443   : > { %v1769_v29 = vmul.f32 %v1745_v9, %v3772_v7  ;;  %2032 = vmatmul.mubr.bf16.gmra.mrb[32].mxu0 %v1778_v54  ;;  %v2874_v9 = vld [vmem:[%s3133_s11 + $0x18] sm:$0xff] }
 0x444   : > { %v1770_v46 = vmul.f32 %v1746_v40, %v3778_v12 }
 0x445   : > { %v1781_v37 = vpack.c.bf16 %v1769_v29, %v1766_v15 }
 0x446   : > { %v1782_v8 = vpack.c.bf16 %v1770_v46, %v1767_v14 }
 0x448   : > { %2039 = vmatprep.mubr.bf16.mxu0 %v1782_v8 }
 0x44b   : > { %2040 = vmatmul.mubr.bf16.gmra.mrb[36].mxu0 %v1781_v37 }
 0x505   : > { %v2470_v20 = vpop.f32.mrb[24].mxu0 }
 0x506   : > { %v2471_v59 = vpop.f32.mrb[25].mxu0 }
 0x507   : > { %v2472_v5 = vadd.f32 %v2471_v59, %v2470_v20  ;;  %v2473_v13 = vpop.f32.mrb[26].mxu0 }
 0x508   : > { %v2474_v32 = vpop.f32.mrb[27].mxu0 }
 0x509   : > { %v2475_v7 = vadd.f32 %v2474_v32, %v2473_v13  ;;  %v2018_v52 = vadd.f32 %v2472_v5, %v3826_v24 }
 0x50a   : > { %v2636_v63 = vpop.f32.mrb[16].mxu1 }
 0x50b   : > { %v2082_v12 = vpop.f32.mrb[17].mxu1  ;;  %v2021_v2 = vadd.f32 %v2475_v7, %v3826_v24 }
 0x50c   : > { %v2083_v56 = vadd.f32 %v2082_v12, %v2018_v52  ;;  %v2637_v26 = vpop.f32.mrb[18].mxu1 }
 0x50d   : > { %v2085_v38 = vpop.f32.mrb[19].mxu1 }
 0x50e   : > { %v2120_v23 = vmul.f32 %v3832_v41, %v2083_v56  ;;  %v2086_v28 = vadd.f32 %v2085_v38, %v2021_v2  ;;  %v2476_v42 = vpop.f32.mrb[28].mxu0  ;;  %v2876_v38 = vld [vmem:[%s3133_s11 + $0x28] sm:$0xff] }
 0x50f   : > { %v2477_v25 = vpop.f32.mrb[29].mxu0 }
 0x510   : > { %v2136_v1 = vrot.slane %v2120_v23, 5  ;;  %v2121_v34 = vmul.f32 %v3832_v41, %v2086_v28  ;;  %v2478_v44 = vadd.f32 %v2477_v25, %v2476_v42  ;;  %v2479_v35 = vpop.f32.mrb[30].mxu0 }
 0x511   : > { %v2480_v36 = vpop.f32.mrb[31].mxu0 }
 0x512   : > { %v2160_v48 = vadd.f32 %v2871_v45, %v2136_v1  ;;  %v2137_v10 = vrot.slane %v2121_v34, 5  ;;  %v2026_v49 = vadd.f32 %v2478_v44, %v3826_v24  ;;  %v2481_v55 = vadd.f32 %v2480_v36, %v2479_v35  ;;  %v2877_v35 = vld [vmem:[%s3133_s11 + $0x30] sm:$0xff]  ;;  %v2878_v45 = vld [vmem:[%s3133_s11 + $0x40] sm:$0xff] }
 0x514   : > { %2169 = vst [vmem:[%s3117_s28 - $0x3] sm:$0xf8] %v2160_v48  ;;  %v2138_v57 = vsel %vm771_vm4, %v2136_v1, %v2137_v10  ;;  %v2091_v18 = vadd.f32 %v2636_v63, %v2026_v49  ;;  %v2029_v21 = vadd.f32 %v2481_v55, %v3826_v24  ;;  %v2875_v63 = vld [vmem:[%s3133_s11 + $0x20] sm:$0xff] }
 0x515   : > { %v2640_v22 = vpop.f32.mrb[20].mxu1  ;;  %v2161_v47 = vadd.f32 %v2872_v31, %v2138_v57 }
 0x516   : > { %v2098_v33 = vpop.f32.mrb[21].mxu1  ;;  %v2122_v53 = vmul.f32 %v3832_v41, %v2091_v18  ;;  %v2094_v50 = vadd.f32 %v2637_v26, %v2029_v21  ;;  %v2482_v61 = vpop.f32.mrb[32].mxu0 }
 0x517   : > { %v2641_v60 = vpop.f32.mrb[22].mxu1  ;;  %2170 = vst [vmem:[%s3117_s28 + $0x5] sm:$0xff] %v2161_v47  ;;  %v2483_v3 = vpop.f32.mrb[33].mxu0 }
 0x518   : > { %v2101_v0 = vpop.f32.mrb[23].mxu1  ;;  %v2139_v19 = vrot.slane %v2122_v53, 5  ;;  %v2123_v62 = vmul.f32 %v3832_v41, %v2094_v50  ;;  %v2484_v16 = vadd.f32 %v2483_v3, %v2482_v61  ;;  %v2485_v4 = vpop.f32.mrb[34].mxu0 }
 0x519   : > { %v2486_v39 = vpop.f32.mrb[35].mxu0 }
 0x51a   : > { %v2140_v51 = vsel %vm771_vm4, %v2137_v10, %v2139_v19  ;;  %v2141_v30 = vrot.slane %v2123_v62, 5  ;;  %v2034_v27 = vadd.f32 %v2484_v16, %v3826_v24  ;;  %v2487_v11 = vadd.f32 %v2486_v39, %v2485_v4  ;;  %v2879_v10 = vld [vmem:[%s3133_s11 + $0x38] sm:$0xff] }
 0x51b   : > { %v2162_v43 = vadd.f32 %v2873_v58, %v2140_v51 }
 0x51c   : > { %v2142_v54 = vsel %vm771_vm4, %v2139_v19, %v2141_v30  ;;  %v2099_v6 = vadd.f32 %v2098_v33, %v2034_v27  ;;  %v2037_v17 = vadd.f32 %v2487_v11, %v3826_v24 }
 0x51d   : > { %2171 = vst [vmem:[%s3117_s28 + $0xd] sm:$0xff] %v2162_v43  ;;  %v2163_v40 = vadd.f32 %v2874_v9, %v2142_v54 }
 0x51e   : > { %v2124_v15 = vmul.f32 %v3832_v41, %v2099_v6  ;;  %v2102_v29 = vadd.f32 %v2101_v0, %v2037_v17  ;;  %v2488_v14 = vpop.f32.mrb[36].mxu0 }
 0x51f   : > { %2172 = vst [vmem:[%s3117_s28 + $0x15] sm:$0xff] %v2163_v40  ;;  %v2489_v46 = vpop.f32.mrb[37].mxu0 }
 0x520   : > { %v2143_v37 = vrot.slane %v2124_v15, 5  ;;  %v2125_v8 = vmul.f32 %v3832_v41, %v2102_v29  ;;  %v2490_v20 = vadd.f32 %v2489_v46, %v2488_v14  ;;  %v2491_v59 = vpop.f32.mrb[38].mxu0 }
 0x521   : > { %v2492_v5 = vpop.f32.mrb[39].mxu0 }
 0x522   : > { %v2144_v13 = vsel %vm771_vm4, %v2141_v30, %v2143_v37  ;;  %v2145_v32 = vrot.slane %v2125_v8, 5  ;;  %v2042_v7 = vadd.f32 %v2490_v20, %v3826_v24  ;;  %v2493_v52 = vadd.f32 %v2492_v5, %v2491_v59 }
 0x523   : > { %v2164_v12 = vadd.f32 %v2875_v63, %v2144_v13 }
 0x524   : > { %v2146_v2 = vsel %vm771_vm4, %v2143_v37, %v2145_v32  ;;  %v2107_v56 = vadd.f32 %v2640_v22, %v2042_v7  ;;  %v2045_v26 = vadd.f32 %v2493_v52, %v3826_v24 }
 0x525   : > { %2173 = vst [vmem:[%s3117_s28 + $0x1d] sm:$0xff] %v2164_v12  ;;  %v2165_v23 = vadd.f32 %v2876_v38, %v2146_v2 }
 0x526   : > { %v2126_v28 = vmul.f32 %v3832_v41, %v2107_v56  ;;  %v2110_v42 = vadd.f32 %v2641_v60, %v2045_v26 }
 0x527   : > { %2174 = vst [vmem:[%s3117_s28 + $0x25] sm:$0xff] %v2165_v23 }
 0x528   : > { %v2147_v25 = vrot.slane %v2126_v28, 5  ;;  %v2127_v1 = vmul.f32 %v3832_v41, %v2110_v42 }
 0x529   : > { %2185 = sbr.rel (!%p3089_p3) target bundleno = 1357 (0x54d), region = 136 }
 0x52a   : > { %v2148_v34 = vsel %vm771_vm4, %v2145_v32, %v2147_v25  ;;  %v2149_v44 = vrot.slane %v2127_v1, 5 }
 0x52b   : > { %v2166_v24 = vadd.f32 %v2877_v35, %v2148_v34 }
 0x52c   : > { %v2150_v36 = vsel %vm771_vm4, %v2147_v25, %v2149_v44  ;;  %v2168_v48 = vadd.f32 %v2878_v45, %v2149_v44 }
 0x52d   : > { %2175 = vst [vmem:[%s3117_s28 + $0x2d] sm:$0xff] %v2166_v24  ;;  %v2167_v49 = vadd.f32 %v2879_v10, %v2150_v36 }
 0x52e   : > { %2177 = vst [vmem:[%s3117_s28 + $0x3d] sm:$0x7] %v2168_v48 }
 0x52f   : > { %2176 = vst [vmem:[%s3117_s28 + $0x35] sm:$0xff] %v2167_v49 }
 0x530   : > { %s3991_s22 = smov (!%p2188_p2, %s2187_s22), 8 }
 0x531   : > { %s3881_s29 = sshll.u32 %s3991_s22, 7 }
 0x532   : > { %s2192_s30 = ssub.s32 1024, %s3881_s29 }
 0x533   : > { %2193 = vsyncadd %s3876_s19, %s2192_s30  ;;  %p2386_p4 = scmp.ne.s32.totalorder %s3881_s29, 0  ;;  %s2674_s11 = smul.u32 25, %s2964_s17 }
 0x534   : > { %s2200_s26 = sshll.u32 %s3117_s28, 4  ;;  %s2980_s22 = smov [#allocation4]   ;;  %s3888_s26 = int_to_ptr.vmem [resolvable:$true] %s2200_s26 }
 0x535   : > { %s2196_s23 = sadd.s32 %s2674_s11, %s2384_s21  ;;  %s2880_s25 = scalar_lea.vmem %s3888_s26, %s3881_s29 }
 0x536   : > { %s2387_s16 = sshll.u32 %s2196_s23, 7  ;;  %p2881_p3 = scmp.ne.s32.totalorder %s3888_s26, %s2880_s25 }
 0x537   : > { %s3893_s12 = scalar_lea.hbm %s3958_s10, %s2387_s16  ;;  %s2884_s17 = sshll.u32 %s2980_s22, 4  ;;  %s2885_s17 = int_to_ptr.vmem [resolvable:$false] %s2884_s17 }
 0x538   : > { %p2882_p5 = pnand %p2881_p3, %p2386_p4  ;;  %s2886_s28 = scalar_lea.vmem %s2885_s17, 2048 }
 0x539   : > { %p2887_p7 = scmp.lt.s32.totalorder %s3888_s26, %s2885_s17  ;;  %p2888_p9 = scmp.lt.s32.totalorder %s2886_s28, %s2880_s25 }
 0x53a   : > { %p2883_p6 = pneg %p2882_p5 }
 0x53b   : > { %p2889_p10 = por %p2888_p9, %p2887_p7 }
 0x53d   : > { %p2890_p11 = pnand %p2889_p10, %p2883_p6 }
 0x53f   : > { %2893 = shalt.err (!%p2890_p11)
}
 0x540   : > { %s2894_s21 = scalar_lea.hbm %s3893_s12, %s3881_s29  ;;  %s2898_s23 = scalar_lea.hbm %s3958_s10, 6400 }
 0x541   : > { %p2895_p12 = scmp.ne.s32.totalorder %s3893_s12, %s2894_s21  ;;  %p2899_p1 = scmp.lt.u32.totalorder %s3893_s12, %s3958_s10 }
 0x542   : > { %p2900_p2 = scmp.lt.u32.totalorder %s2898_s23, %s2894_s21  ;;  %p2902_p5 = scmp.lt.u32.totalorder %s2894_s21, %s3893_s12 }
 0x543   : > { %p2896_p13 = pnand %p2895_p12, %p2386_p4 }
 0x544   : > { %p2901_p3 = por %p2900_p2, %p2899_p1 }
 0x545   : > { %p2897_p0 = pneg %p2896_p13 }
 0x546   : > { %p2903_p6 = por %p2902_p5, %p2901_p3 }
 0x548   : > { %p2904_p7 = pnand %p2903_p6, %p2897_p0 }
 0x54a   : > { %2907 = shalt.err (!%p2904_p7)
}
 0x54b   : > { %s2981_s24 = smov 128   ;;  %s2982_s25 = smov 8  }
 0x54c   : > { %2206 = dma.vmem_to_hbm [thread:$0]  (%p2386_p4), %s3888_s26, %s3881_s29, %s3893_s12, %s3876_s19, %s2981_s24, %s2981_s24, %s2982_s25  }
 0x54d PF: > { %p2680_p9 = scmp.ge.s32.totalorder %s2976_s20, 2  ;;  %s2215_s22 = sand.u32 1, %s2948_s13  }
 0x54e   : > { %s2216_s17 = scalar_lea.sflag [#allocation5], %s2215_s22 }
 0x54f   : > { %p2677_p10 = pnand %p2680_p9, %p3098_p8 }
 0x551   : > { %2943 = dma.done.wait (!%p2677_p10), %s2216_s17, 1024  }
 0x552   : > { %2945 = vsyncadd (!%p2677_p10), %s2216_s17, 4294966272  ;;  %s23_s20 = sadd.s32 1, %s2976_s20   ;;  %s3972_s28 = sld [smem:[#allocation14_spill]] }
 0x553   : > { %p20_p11 = scmp.ge.s32.totalorder %s23_s20, 10   ;;  %s3973_s16 = sld [smem:[#allocation10_spill]] }
 0x554   : > { %s3974_s17 = sld [smem:[#allocation11_spill]]  ;;  %s3975_s18 = sld [smem:[#allocation12_spill]] }
 0x555   : > { %s3976_s19 = sld [smem:[#allocation13_spill]]  ;;  %s3977_s13 = smov %s2952_s14 }
 0x556   : > { %s3978_s14 = smov %s2956_s15  ;;  %22 = sbr.rel (!%p20_p11) target bundleno = 5 (0x5), region = 187 }
 0x558   : > { %s3979_s15 = smov %s3972_s28 }
 0x55d   :  { %2221 = vsyncpa [#allocation5], 1 }
 0x55e   :  { %2223 = vsyncpa [#allocation5 + $0x1], 1 }
 0x55f   :  { %2224 = vsyncmov [#allocation3] }
 0x562   :  { %s2225_s27 = vpop.sfrf %2224 }
 0x563   :  { %p2392_p8 = scmp.ne.s32.totalorder %s2225_s27, 0 }
 0x565   :  { %2229 = shalt.err (%p2392_p8)  }
 0x566   :  { %2231 = vsyncmov [#allocation3 + $0x1] }
 0x569   :  { %s2232_s29 = vpop.sfrf %2231 }
 0x56a   :  { %p2393_p4 = scmp.ne.s32.totalorder %s2232_s29, 0 }
 0x56c   :  { %2236 = shalt.err (%p2393_p4)  }

</bundles_post_ra>
